<compile_context>
chip_gen: v7x
topology: tpu7x:2x2x1
jax: 0.10.0
libtpu: 0.0.40
codegen_flags: <defaults>
</compile_context>

<pallas_src>
import functools

import jax
import jax.numpy as jnp
from jax.experimental import pallas as pl
from jax.experimental.pallas import tpu as pltpu

LN_EPS = 1e-5


def _round_up(x, m):
    return ((x + m - 1) // m) * m


def _tpu_caps():
    """Best-effort (vmem_limit_bytes, has_bf16_valu). Conservative fallbacks; never raises."""
    vmem_cap = None
    try:
        vmem_cap = int(pltpu.get_tpu_info().vmem_capacity_bytes)
    except Exception:
        vmem_cap = None
    kind = ""
    try:
        kind = jax.devices()[0].device_kind.lower()
    except Exception:
        pass
    # bf16 VALU exists on v6e and later; not on v2-v5.
    bf16_valu = not any(t in kind for t in ("v2", "v3", "v4", "v5"))
    if vmem_cap is None:
        vmem_cap = 128 * 1024 * 1024
    if vmem_cap <= 80 * 1024 * 1024:          # v7x-class: 64 MiB physical VMEM
        vmem_limit = 40 * 1024 * 1024
    else:                                     # v5e/v6e: 128 MiB physical VMEM
        vmem_limit = 64 * 1024 * 1024
    return vmem_limit, bf16_valu


def _linear(h, w_ref, b_ref, compute_dtype):
    # bf16 (or f32) MXU matmul with f32 accumulation; bias add in f32.
    return jnp.dot(h.astype(compute_dtype), w_ref[...],
                   preferred_element_type=jnp.float32) + b_ref[...]


def _layernorm(h, g_ref, b_ref):
    # E[h^2] - mu^2 form: two reductions + one affine pass, no (h-mu)^2 temporary.
    mu = jnp.mean(h, axis=-1, keepdims=True)
    ms = jnp.mean(h * h, axis=-1, keepdims=True)
    inv = jax.lax.rsqrt(jnp.maximum(ms - mu * mu, 0.0) + LN_EPS)
    return (h - mu) * inv * g_ref[...] + b_ref[...]


def _relu(h):
    return jnp.maximum(h, 0.0)


# ---------------------------------------------------------------------------
# Kernel A: per-point MLP + running max-pool over the (tiled) point axis.
# Grid = (B*n_splits, num_n_chunks); the output block index is constant across
# the n-axis so the (1,1,1024) block stays resident and acts as the accumulator.
# ---------------------------------------------------------------------------
def point_mlp_kernel(x_ref,
                     w1_ref, b1_ref, g1_ref, bb1_ref,
                     w2_ref, b2_ref, g2_ref, bb2_ref,
                     w3_ref, b3_ref, g3_ref, bb3_ref,
                     pooled_ref,
                     *, compute_dtype, ew_dtype):
    n_idx = pl.program_id(1)

    x = x_ref[0]                                                        # (tn, k) compute dtype
    h = _relu(_layernorm(_linear(x, w1_ref, b1_ref, compute_dtype), g1_ref, bb1_ref))
    h = _relu(_layernorm(_linear(h, w2_ref, b2_ref, compute_dtype), g2_ref, bb2_ref))

    # Layer 3 (128 -> 1024): stats in f32, affine in ew_dtype (bf16 on v6e/v7x).
    h3 = _linear(h, w3_ref, b3_ref, compute_dtype)                      # (tn, 1024) f32
    mu = jnp.mean(h3, axis=-1, keepdims=True)
    ms = jnp.mean(h3 * h3, axis=-1, keepdims=True)
    inv = jax.lax.rsqrt(jnp.maximum(ms - mu * mu, 0.0) + LN_EPS)
    e = ew_dtype
    y = (h3.astype(e) - mu.astype(e)) * inv.astype(e) * g3_ref[...] + bb3_ref[...]
    # NOTE: layer-3 ReLU is deferred past the max-pool (relu(max(x)) == max(relu(x)));
    # it is applied once on the pooled vector in the head kernel.
    # NOTE: no tail mask needed: padded rows are edge-replicas of the last real point,
    # so they cannot change the max.

    chunk_max = jnp.max(y, axis=0, keepdims=True).astype(jnp.float32)   # (1, 1024)

    @pl.when(n_idx == 0)
    def _():
        pooled_ref[0] = chunk_max

    @pl.when(n_idx > 0)
    def _():
        pooled_ref[0] = jnp.maximum(pooled_ref[0], chunk_max)


# ---------------------------------------------------------------------------
# Kernel B: batched FC head (1024 -> 512 -> 256 -> k*k) + fused +eye(k).
# Output padded to a lane-dense (tb, round_up(k*k,128)) block.
# ---------------------------------------------------------------------------
def head_kernel(p_ref,
                w4_ref, b4_ref, g4_ref, bb4_ref,
                w5_ref, b5_ref, g5_ref, bb5_ref,
                w6_ref, b6_ref,
                out_ref,
                *, k, compute_dtype):
    h = jnp.maximum(p_ref[...], 0.0)                                    # deferred layer-3 ReLU
    h = _relu(_layernorm(_linear(h, w4_ref, b4_ref, compute_dtype), g4_ref, bb4_ref))
    h = _relu(_layernorm(_linear(h, w5_ref, b5_ref, compute_dtype), g5_ref, bb5_ref))
    h = _linear(h, w6_ref, b6_ref, compute_dtype)                       # (tb, kk_pad)

    # flattened identity: row-major eye(k) has ones at flat indices 0, k+1, 2(k+1), ...
    idx = jax.lax.broadcasted_iota(jnp.int32, h.shape, 1)
    eye_flat = jnp.where(jnp.logical_and(idx < k * k, idx % (k + 1) == 0), 1.0, 0.0)
    out_ref[...] = (h + eye_flat).astype(out_ref.dtype)


# ---------------------------------------------------------------------------
# Wrapper
# ---------------------------------------------------------------------------
def stnkd_forward(x, params, *, k, compute_dtype=jnp.bfloat16, tn=None, tb=128,
                  n_splits=None, elementwise_dtype=None):
    B, N, kk = x.shape
    assert kk == k

    vmem_limit, bf16_valu = _tpu_caps()
    cd = jnp.dtype(compute_dtype)
    if elementwise_dtype is None:
        ew = cd if (bf16_valu and cd == jnp.bfloat16) else jnp.dtype(jnp.float32)
    else:
        ew = jnp.dtype(elementwise_dtype)

    (w1, b1, g1, bb1, w2, b2, g2, bb2, w3, b3, g3, bb3,
     w4, b4, g4, bb4, w5, b5, g5, bb5, w6, b6) = params

    conv_params = [w1.astype(cd), b1, g1, bb1,
                   w2.astype(cd), b2, g2, bb2,
                   w3.astype(cd), b3, g3.astype(ew), bb3.astype(ew)]

    kk_pad = max(128, _round_up(k * k, 128))
    if kk_pad != k * k:
        w6p = jnp.pad(w6, ((0, 0), (0, kk_pad - k * k)))
        b6p = jnp.pad(b6, ((0, 0), (0, kk_pad - k * k)))
    else:
        w6p, b6p = w6, b6
    head_params = [w4.astype(cd), b4, g4, bb4,
                   w5.astype(cd), b5, g5, bb5,
                   w6p.astype(cd), b6p]

    # ---------------- Kernel A: per-point MLP + max-pool ----------------
    if n_splits is None:
        # Fill both v7x TensorCores when the batch alone cannot.
        n_splits = 2 if (B == 1 and N >= 2048) else 1
    n_splits = max(1, int(n_splits))

    per_split = pl.cdiv(N, n_splits)
    if tn is None:
        tn = 2048 if vmem_limit > 48 * 1024 * 1024 else 1024
    tn = _round_up(min(tn, _round_up(per_split, 8)), 8)
    L = _round_up(per_split, tn)          # padded points per split
    num_n = L // tn
    n_pad = n_splits * L

    # Stream x in the compute dtype (bf16): halves the only N-scaling DMA.
    x_in = x.astype(cd)
    if n_pad != N:
        # Edge-replicate the last real point: replicas can never change the max,
        # so no in-kernel tail masking is needed.
        x_in = jnp.pad(x_in, ((0, 0), (0, n_pad - N), (0, 0)), mode="edge")
    x_in = x_in.reshape(B * n_splits, L, k)

    a_in_specs = [pl.BlockSpec((1, tn, k), lambda b, n: (b, n, 0))]
    a_in_specs += [pl.BlockSpec(p.shape, lambda b, n: (0, 0)) for p in conv_params]

    conv_bytes = sum(int(p.size) * p.dtype.itemsize for p in conv_params)
    rows = B * n_splits * L
    flops_a = 2 * rows * (k * 64 + 64 * 128 + 128 * 1024)
    bytes_a = int(x_in.size) * x_in.dtype.itemsize + conv_bytes + B * n_splits * 1024 * 4

    pooled = pl.pallas_call(
        functools.partial(point_mlp_kernel, compute_dtype=cd, ew_dtype=ew),
        out_shape=jax.ShapeDtypeStruct((B * n_splits, 1, 1024), jnp.float32),
        grid_spec=pltpu.PrefetchScalarGridSpec(
            num_scalar_prefetch=0,
            grid=(B * n_splits, num_n),
            in_specs=a_in_specs,
            out_specs=pl.BlockSpec((1, 1, 1024), lambda b, n: (b, 0, 0)),
        ),
        compiler_params=pltpu.CompilerParams(
            dimension_semantics=("parallel", "arbitrary"),
            vmem_limit_bytes=vmem_limit),
        cost_estimate=pl.CostEstimate(
            flops=int(flops_a),
            transcendentals=int(3 * rows),
            bytes_accessed=int(bytes_a)),
    )(x_in, *conv_params)

    # Combine split partial maxes (tiny op; also where the deferred ReLU could live,
    # but we apply it in Kernel B to keep it fused).
    pooled2 = pooled.reshape(B, n_splits, 1024)
    pooled2 = jnp.max(pooled2, axis=1) if n_splits > 1 else pooled2[:, 0]

    # ---------------- Kernel B: batched FC head ----------------
    if B <= tb:
        tb_eff = _round_up(B, 8)
        b_pad = tb_eff
    else:
        tb_eff = _round_up(tb, 8)
        b_pad = _round_up(B, tb_eff)
    if b_pad != B:
        pooled2 = jnp.pad(pooled2, ((0, b_pad - B), (0, 0)))

    b_in_specs = [pl.BlockSpec((tb_eff, 1024), lambda i: (i, 0))]
    b_in_specs += [pl.BlockSpec(p.shape, lambda i: (0, 0)) for p in head_params]

    head_bytes = sum(int(p.size) * p.dtype.itemsize for p in head_params)
    flops_b = 2 * b_pad * (1024 * 512 + 512 * 256 + 256 * kk_pad)
    bytes_b = b_pad * 1024 * 4 + head_bytes + b_pad * kk_pad * 4

    out = pl.pallas_call(
        functools.partial(head_kernel, k=k, compute_dtype=cd),
        out_shape=jax.ShapeDtypeStruct((b_pad, kk_pad), jnp.float32),
        grid_spec=pltpu.PrefetchScalarGridSpec(
            num_scalar_prefetch=0,
            grid=(b_pad // tb_eff,),
            in_specs=b_in_specs,
            out_specs=pl.BlockSpec((tb_eff, kk_pad), lambda i: (i, 0)),
        ),
        compiler_params=pltpu.CompilerParams(
            dimension_semantics=("parallel",),
            vmem_limit_bytes=vmem_limit),
        cost_estimate=pl.CostEstimate(
            flops=int(flops_b),
            transcendentals=int(2 * b_pad),
            bytes_accessed=int(bytes_b)),
    )(pooled2, *head_params)

    return out[:B, :k * k].reshape(B, k, k)


# ---------------------------------------------------------------------------
# Parameter init + matched-precision reference (bf16 matmuls, f32 stats,
# layer-3 LN affine in ew3_dtype to mirror the kernel's elementwise dtype).
# ---------------------------------------------------------------------------
def init_params(key, k):
    dims = [(k, 64), (64, 128), (128, 1024), (1024, 512), (512, 256), (256, k * k)]
    has_ln = [True, True, True, True, True, False]
    params = []
    for (din, dout), ln in zip(dims, has_ln):
        key, kw, kb, kg, kbb = jax.random.split(key, 5)
        w = (jax.random.normal(kw, (din, dout), jnp.float32) / jnp.sqrt(din)).astype(jnp.float32)
        b = 0.01 * jax.random.normal(kb, (1, dout), jnp.float32)
        params += [w, b]
        if ln:
            g = 1.0 + 0.05 * jax.random.normal(kg, (1, dout), jnp.float32)
            bb = 0.05 * jax.random.normal(kbb, (1, dout), jnp.float32)
            params += [g, bb]
    return params


def ref_forward(x, params, *, k, compute_dtype=jnp.bfloat16, ew3_dtype=jnp.float32):
    (w1, b1, g1, bb1, w2, b2, g2, bb2, w3, b3, g3, bb3,
     w4, b4, g4, bb4, w5, b5, g5, bb5, w6, b6) = params
    cd = compute_dtype

    def lin(h, w, b):
        return jnp.dot(h.astype(cd), w.astype(cd), preferred_element_type=jnp.float32) + b

    def ln(h, g, b):
        mu = jnp.mean(h, axis=-1, keepdims=True)
        var = jnp.mean((h - mu) ** 2, axis=-1, keepdims=True)
        return (h - mu) * jax.lax.rsqrt(var + LN_EPS) * g + b

    relu = lambda h: jnp.maximum(h, 0.0)

    h = relu(ln(lin(x, w1, b1), g1, bb1))
    h = relu(ln(lin(h, w2, b2), g2, bb2))

    h3 = lin(h, w3, b3)
    mu = jnp.mean(h3, axis=-1, keepdims=True)
    var = jnp.mean((h3 - mu) ** 2, axis=-1, keepdims=True)
    inv = jax.lax.rsqrt(var + LN_EPS)
    e = ew3_dtype
    h = (h3.astype(e) - mu.astype(e)) * inv.astype(e) * g3.astype(e) + bb3.astype(e)

    h = relu(jnp.max(h, axis=-2, keepdims=True).astype(jnp.float32))   # max-then-relu == relu-then-max
    h = relu(ln(lin(h, w4, b4), g4, bb4))
    h = relu(ln(lin(h, w5, b5), g5, bb5))
    h = lin(h, w6, b6)                                                  # (B, 1, k*k)
    B = x.shape[0]
    return h.reshape(B, k, k) + jnp.eye(k, dtype=h.dtype)


if __name__ == "__main__":
    B, N, k = 2, 40, 4
    key = jax.random.PRNGKey(0)
    key, kx = jax.random.split(key)
    x = jax.random.normal(kx, (B, N, k), jnp.float32)
    params = init_params(key, k)

    _, bf16_valu = _tpu_caps()
    auto_ew = jnp.bfloat16 if bf16_valu else jnp.float32

    # (1) Auto config; tn=16 forces several point chunks plus an edge-padded tail,
    #     exercising the running max-pool and the batched lane-dense head.
    out = jax.block_until_ready(stnkd_forward(x, params, k=k, tn=16))
    ref = ref_forward(x, params, k=k, ew3_dtype=auto_ew)
    assert out.shape == (B, k, k)
    err = float(jnp.max(jnp.abs(out - ref)))
    assert jnp.allclose(out, ref, atol=2e-2, rtol=2e-2), f"max abs err = {err}"

    # (2) B==1 with the point axis split in two (the small-batch megacore path)
    #     and explicit f32 elementwise for a tightly matched comparison.
    x1 = x[:1]
    out1 = jax.block_until_ready(
        stnkd_forward(x1, params, k=k, tn=16, n_splits=2,
                      elementwise_dtype=jnp.float32))
    ref1 = ref_forward(x1, params, k=k, ew3_dtype=jnp.float32)
    err1 = float(jnp.max(jnp.abs(out1 - ref1)))
    assert out1.shape == (1, k, k)
    assert jnp.allclose(out1, ref1, atol=2e-2, rtol=2e-2), f"max abs err = {err1}"

    print("KERNEL_OK")
</pallas_src>

<mosaic_0001>
module attributes {stable_mosaic.version = 11 : i64} {
  func.func @point_mlp_kernel(%arg0: i32, %arg1: i32, %arg2: memref<1x16x4xbf16, #tpu.memory_space<vmem>>, %arg3: memref<4x64xbf16, #tpu.memory_space<vmem>>, %arg4: memref<1x64xf32, #tpu.memory_space<vmem>>, %arg5: memref<1x64xf32, #tpu.memory_space<vmem>>, %arg6: memref<1x64xf32, #tpu.memory_space<vmem>>, %arg7: memref<64x128xbf16, #tpu.memory_space<vmem>>, %arg8: memref<1x128xf32, #tpu.memory_space<vmem>>, %arg9: memref<1x128xf32, #tpu.memory_space<vmem>>, %arg10: memref<1x128xf32, #tpu.memory_space<vmem>>, %arg11: memref<128x1024xbf16, #tpu.memory_space<vmem>>, %arg12: memref<1x1024xf32, #tpu.memory_space<vmem>>, %arg13: memref<1x1024xbf16, #tpu.memory_space<vmem>>, %arg14: memref<1x1024xbf16, #tpu.memory_space<vmem>>, %arg15: memref<1x1x1024xf32, #tpu.memory_space<vmem>>) attributes {dimension_semantics = [#tpu.dimension_semantics<parallel>, #tpu.dimension_semantics<arbitrary>], iteration_bounds = array<i64: 2, 3>, scalar_prefetch = 0 : i64, scratch_operands = 0 : i64, tpu.core_type = #tpu.core_type<tc>, window_params = [{transform_indices = @transform_0, window_bounds = array<i64: 1, 16, 4>}, {pipeline_mode = #tpu.pipeline_mode<synchronous>, transform_indices = @transform_1, window_bounds = array<i64: 4, 64>}, {pipeline_mode = #tpu.pipeline_mode<synchronous>, transform_indices = @transform_2, window_bounds = array<i64: 1, 64>}, {pipeline_mode = #tpu.pipeline_mode<synchronous>, transform_indices = @transform_3, window_bounds = array<i64: 1, 64>}, {pipeline_mode = #tpu.pipeline_mode<synchronous>, transform_indices = @transform_4, window_bounds = array<i64: 1, 64>}, {pipeline_mode = #tpu.pipeline_mode<synchronous>, transform_indices = @transform_5, window_bounds = array<i64: 64, 128>}, {pipeline_mode = #tpu.pipeline_mode<synchronous>, transform_indices = @transform_6, window_bounds = array<i64: 1, 128>}, {pipeline_mode = #tpu.pipeline_mode<synchronous>, transform_indices = @transform_7, window_bounds = array<i64: 1, 128>}, {pipeline_mode = #tpu.pipeline_mode<synchronous>, transform_indices = @transform_8, window_bounds = array<i64: 1, 128>}, {pipeline_mode = #tpu.pipeline_mode<synchronous>, transform_indices = @transform_9, window_bounds = array<i64: 128, 1024>}, {pipeline_mode = #tpu.pipeline_mode<synchronous>, transform_indices = @transform_10, window_bounds = array<i64: 1, 1024>}, {pipeline_mode = #tpu.pipeline_mode<synchronous>, transform_indices = @transform_11, window_bounds = array<i64: 1, 1024>}, {pipeline_mode = #tpu.pipeline_mode<synchronous>, transform_indices = @transform_12, window_bounds = array<i64: 1, 1024>}, {transform_indices = @transform_13, window_bounds = array<i64: 1, 1, 1024>}]} {
    %c0 = arith.constant 0 : index
    %c0_0 = arith.constant 0 : index
    %c0_1 = arith.constant 0 : index
    %0 = vector.load %arg2[%c0, %c0_0, %c0_1] : memref<1x16x4xbf16, #tpu.memory_space<vmem>>, vector<1x16x4xbf16>
    %1 = vector.shape_cast %0 : vector<1x16x4xbf16> to vector<16x4xbf16>
    %c0_2 = arith.constant 0 : index
    %c0_3 = arith.constant 0 : index
    %2 = vector.load %arg3[%c0_2, %c0_3] : memref<4x64xbf16, #tpu.memory_space<vmem>>, vector<4x64xbf16>
    %cst = arith.constant dense<0.000000e+00> : vector<16x64xf32>
    %3 = tpu.matmul %1, %2, %cst {dimension_numbers = #tpu.dot_dimension_numbers<[1], [0], [0], [1], [0, 0, 1, 1], [], []>} : vector<16x4xbf16>, vector<4x64xbf16>, vector<16x64xf32> -> vector<16x64xf32>
    %c0_4 = arith.constant 0 : index
    %c0_5 = arith.constant 0 : index
    %4 = vector.load %arg4[%c0_4, %c0_5] : memref<1x64xf32, #tpu.memory_space<vmem>>, vector<1x64xf32>
    %5 = vector.broadcast %4 : vector<1x64xf32> to vector<16x64xf32>
    %6 = arith.addf %3, %5 : vector<16x64xf32>
    %cst_6 = arith.constant dense<0.000000e+00> : vector<16xf32>
    %7 = vector.multi_reduction <add>, %6, %cst_6 [1] : vector<16x64xf32> to vector<16xf32>
    %8 = vector.shape_cast %7 : vector<16xf32> to vector<16x1xf32>
    %cst_7 = arith.constant 6.400000e+01 : f32
    %9 = vector.broadcast %cst_7 : f32 to vector<16x1xf32>
    %10 = arith.divf %8, %9 : vector<16x1xf32>
    %11 = arith.mulf %6, %6 : vector<16x64xf32>
    %cst_8 = arith.constant dense<0.000000e+00> : vector<16xf32>
    %12 = vector.multi_reduction <add>, %11, %cst_8 [1] : vector<16x64xf32> to vector<16xf32>
    %13 = vector.shape_cast %12 : vector<16xf32> to vector<16x1xf32>
    %cst_9 = arith.constant 6.400000e+01 : f32
    %14 = vector.broadcast %cst_9 : f32 to vector<16x1xf32>
    %15 = arith.divf %13, %14 : vector<16x1xf32>
    %16 = arith.mulf %10, %10 : vector<16x1xf32>
    %17 = arith.subf %15, %16 : vector<16x1xf32>
    %cst_10 = arith.constant 0.000000e+00 : f32
    %18 = vector.broadcast %cst_10 : f32 to vector<16x1xf32>
    %19 = arith.maximumf %17, %18 : vector<16x1xf32>
    %cst_11 = arith.constant 9.99999974E-6 : f32
    %20 = vector.broadcast %cst_11 : f32 to vector<16x1xf32>
    %21 = arith.addf %19, %20 : vector<16x1xf32>
    %22 = math.rsqrt %21 : vector<16x1xf32>
    %23 = vector.broadcast %10 : vector<16x1xf32> to vector<16x64xf32>
    %24 = arith.subf %6, %23 : vector<16x64xf32>
    %25 = vector.broadcast %22 : vector<16x1xf32> to vector<16x64xf32>
    %26 = arith.mulf %24, %25 : vector<16x64xf32>
    %c0_12 = arith.constant 0 : index
    %c0_13 = arith.constant 0 : index
    %27 = vector.load %arg5[%c0_12, %c0_13] : memref<1x64xf32, #tpu.memory_space<vmem>>, vector<1x64xf32>
    %28 = vector.broadcast %27 : vector<1x64xf32> to vector<16x64xf32>
    %29 = arith.mulf %26, %28 : vector<16x64xf32>
    %c0_14 = arith.constant 0 : index
    %c0_15 = arith.constant 0 : index
    %30 = vector.load %arg6[%c0_14, %c0_15] : memref<1x64xf32, #tpu.memory_space<vmem>>, vector<1x64xf32>
    %31 = vector.broadcast %30 : vector<1x64xf32> to vector<16x64xf32>
    %32 = arith.addf %29, %31 : vector<16x64xf32>
    %cst_16 = arith.constant 0.000000e+00 : f32
    %33 = vector.broadcast %cst_16 : f32 to vector<16x64xf32>
    %34 = arith.maximumf %32, %33 : vector<16x64xf32>
    %35 = arith.truncf %34 : vector<16x64xf32> to vector<16x64xbf16>
    %c0_17 = arith.constant 0 : index
    %c0_18 = arith.constant 0 : index
    %36 = vector.load %arg7[%c0_17, %c0_18] : memref<64x128xbf16, #tpu.memory_space<vmem>>, vector<64x128xbf16>
    %cst_19 = arith.constant dense<0.000000e+00> : vector<16x128xf32>
    %37 = tpu.matmul %35, %36, %cst_19 {dimension_numbers = #tpu.dot_dimension_numbers<[1], [0], [0], [1], [0, 0, 1, 1], [], []>} : vector<16x64xbf16>, vector<64x128xbf16>, vector<16x128xf32> -> vector<16x128xf32>
    %c0_20 = arith.constant 0 : index
    %c0_21 = arith.constant 0 : index
    %38 = vector.load %arg8[%c0_20, %c0_21] : memref<1x128xf32, #tpu.memory_space<vmem>>, vector<1x128xf32>
    %39 = vector.broadcast %38 : vector<1x128xf32> to vector<16x128xf32>
    %40 = arith.addf %37, %39 : vector<16x128xf32>
    %cst_22 = arith.constant dense<0.000000e+00> : vector<16xf32>
    %41 = vector.multi_reduction <add>, %40, %cst_22 [1] : vector<16x128xf32> to vector<16xf32>
    %42 = vector.shape_cast %41 : vector<16xf32> to vector<16x1xf32>
    %cst_23 = arith.constant 1.280000e+02 : f32
    %43 = vector.broadcast %cst_23 : f32 to vector<16x1xf32>
    %44 = arith.divf %42, %43 : vector<16x1xf32>
    %45 = arith.mulf %40, %40 : vector<16x128xf32>
    %cst_24 = arith.constant dense<0.000000e+00> : vector<16xf32>
    %46 = vector.multi_reduction <add>, %45, %cst_24 [1] : vector<16x128xf32> to vector<16xf32>
    %47 = vector.shape_cast %46 : vector<16xf32> to vector<16x1xf32>
    %cst_25 = arith.constant 1.280000e+02 : f32
    %48 = vector.broadcast %cst_25 : f32 to vector<16x1xf32>
    %49 = arith.divf %47, %48 : vector<16x1xf32>
    %50 = arith.mulf %44, %44 : vector<16x1xf32>
    %51 = arith.subf %49, %50 : vector<16x1xf32>
    %cst_26 = arith.constant 0.000000e+00 : f32
    %52 = vector.broadcast %cst_26 : f32 to vector<16x1xf32>
    %53 = arith.maximumf %51, %52 : vector<16x1xf32>
    %cst_27 = arith.constant 9.99999974E-6 : f32
    %54 = vector.broadcast %cst_27 : f32 to vector<16x1xf32>
    %55 = arith.addf %53, %54 : vector<16x1xf32>
    %56 = math.rsqrt %55 : vector<16x1xf32>
    %57 = vector.broadcast %44 : vector<16x1xf32> to vector<16x128xf32>
    %58 = arith.subf %40, %57 : vector<16x128xf32>
    %59 = vector.broadcast %56 : vector<16x1xf32> to vector<16x128xf32>
    %60 = arith.mulf %58, %59 : vector<16x128xf32>
    %c0_28 = arith.constant 0 : index
    %c0_29 = arith.constant 0 : index
    %61 = vector.load %arg9[%c0_28, %c0_29] : memref<1x128xf32, #tpu.memory_space<vmem>>, vector<1x128xf32>
    %62 = vector.broadcast %61 : vector<1x128xf32> to vector<16x128xf32>
    %63 = arith.mulf %60, %62 : vector<16x128xf32>
    %c0_30 = arith.constant 0 : index
    %c0_31 = arith.constant 0 : index
    %64 = vector.load %arg10[%c0_30, %c0_31] : memref<1x128xf32, #tpu.memory_space<vmem>>, vector<1x128xf32>
    %65 = vector.broadcast %64 : vector<1x128xf32> to vector<16x128xf32>
    %66 = arith.addf %63, %65 : vector<16x128xf32>
    %cst_32 = arith.constant 0.000000e+00 : f32
    %67 = vector.broadcast %cst_32 : f32 to vector<16x128xf32>
    %68 = arith.maximumf %66, %67 : vector<16x128xf32>
    %69 = arith.truncf %68 : vector<16x128xf32> to vector<16x128xbf16>
    %c0_33 = arith.constant 0 : index
    %c0_34 = arith.constant 0 : index
    %70 = vector.load %arg11[%c0_33, %c0_34] : memref<128x1024xbf16, #tpu.memory_space<vmem>>, vector<128x1024xbf16>
    %cst_35 = arith.constant dense<0.000000e+00> : vector<16x1024xf32>
    %71 = tpu.matmul %69, %70, %cst_35 {dimension_numbers = #tpu.dot_dimension_numbers<[1], [0], [0], [1], [0, 0, 1, 1], [], []>} : vector<16x128xbf16>, vector<128x1024xbf16>, vector<16x1024xf32> -> vector<16x1024xf32>
    %c0_36 = arith.constant 0 : index
    %c0_37 = arith.constant 0 : index
    %72 = vector.load %arg12[%c0_36, %c0_37] : memref<1x1024xf32, #tpu.memory_space<vmem>>, vector<1x1024xf32>
    %73 = vector.broadcast %72 : vector<1x1024xf32> to vector<16x1024xf32>
    %74 = arith.addf %71, %73 : vector<16x1024xf32>
    %cst_38 = arith.constant dense<0.000000e+00> : vector<16xf32>
    %75 = vector.multi_reduction <add>, %74, %cst_38 [1] : vector<16x1024xf32> to vector<16xf32>
    %76 = vector.shape_cast %75 : vector<16xf32> to vector<16x1xf32>
    %cst_39 = arith.constant 1.024000e+03 : f32
    %77 = vector.broadcast %cst_39 : f32 to vector<16x1xf32>
    %78 = arith.divf %76, %77 : vector<16x1xf32>
    %79 = arith.mulf %74, %74 : vector<16x1024xf32>
    %cst_40 = arith.constant dense<0.000000e+00> : vector<16xf32>
    %80 = vector.multi_reduction <add>, %79, %cst_40 [1] : vector<16x1024xf32> to vector<16xf32>
    %81 = vector.shape_cast %80 : vector<16xf32> to vector<16x1xf32>
    %cst_41 = arith.constant 1.024000e+03 : f32
    %82 = vector.broadcast %cst_41 : f32 to vector<16x1xf32>
    %83 = arith.divf %81, %82 : vector<16x1xf32>
    %84 = arith.mulf %78, %78 : vector<16x1xf32>
    %85 = arith.subf %83, %84 : vector<16x1xf32>
    %cst_42 = arith.constant 0.000000e+00 : f32
    %86 = vector.broadcast %cst_42 : f32 to vector<16x1xf32>
    %87 = arith.maximumf %85, %86 : vector<16x1xf32>
    %cst_43 = arith.constant 9.99999974E-6 : f32
    %88 = vector.broadcast %cst_43 : f32 to vector<16x1xf32>
    %89 = arith.addf %87, %88 : vector<16x1xf32>
    %90 = math.rsqrt %89 : vector<16x1xf32>
    %91 = arith.truncf %74 : vector<16x1024xf32> to vector<16x1024xbf16>
    %92 = arith.truncf %78 : vector<16x1xf32> to vector<16x1xbf16>
    %93 = vector.broadcast %92 : vector<16x1xbf16> to vector<16x1024xbf16>
    %94 = arith.subf %91, %93 : vector<16x1024xbf16>
    %95 = arith.truncf %90 : vector<16x1xf32> to vector<16x1xbf16>
    %96 = vector.broadcast %95 : vector<16x1xbf16> to vector<16x1024xbf16>
    %97 = arith.mulf %94, %96 : vector<16x1024xbf16>
    %c0_44 = arith.constant 0 : index
    %c0_45 = arith.constant 0 : index
    %98 = vector.load %arg13[%c0_44, %c0_45] : memref<1x1024xbf16, #tpu.memory_space<vmem>>, vector<1x1024xbf16>
    %99 = vector.broadcast %98 : vector<1x1024xbf16> to vector<16x1024xbf16>
    %100 = arith.mulf %97, %99 : vector<16x1024xbf16>
    %c0_46 = arith.constant 0 : index
    %c0_47 = arith.constant 0 : index
    %101 = vector.load %arg14[%c0_46, %c0_47] : memref<1x1024xbf16, #tpu.memory_space<vmem>>, vector<1x1024xbf16>
    %102 = vector.broadcast %101 : vector<1x1024xbf16> to vector<16x1024xbf16>
    %103 = arith.addf %100, %102 : vector<16x1024xbf16>
    %cst_48 = arith.constant dense<0xFF80> : vector<1024xbf16>
    %104 = vector.multi_reduction <maximumf>, %103, %cst_48 [0] : vector<16x1024xbf16> to vector<1024xbf16>
    %105 = vector.shape_cast %104 : vector<1024xbf16> to vector<1x1024xbf16>
    %106 = arith.extf %105 : vector<1x1024xbf16> to vector<1x1024xf32>
    %c0_i32 = arith.constant 0 : i32
    %107 = arith.cmpi eq, %arg1, %c0_i32 : i32
    %108 = arith.extui %107 : i1 to i32
    %c0_i32_49 = arith.constant 0 : i32
    %109 = arith.cmpi ne, %108, %c0_i32_49 : i32
    scf.if %109 {
      %c0_52 = arith.constant 0 : index
      %c0_53 = arith.constant 0 : index
      %c0_54 = arith.constant 0 : index
      %113 = vector.load %arg15[%c0_52, %c0_53, %c0_54] : memref<1x1x1024xf32, #tpu.memory_space<vmem>>, vector<1x1x1024xf32>
      %114 = vector.shape_cast %113 : vector<1x1x1024xf32> to vector<1x1024xf32>
      %115 = vector.shape_cast %106 : vector<1x1024xf32> to vector<1x1x1024xf32>
      tpu.vector_store %arg15[%c0_52, %c0_53, %c0_54], %115 {strides = array<i32>} : memref<1x1x1024xf32, #tpu.memory_space<vmem>>, vector<1x1x1024xf32>,
    } else {
    }
    %c0_i32_50 = arith.constant 0 : i32
    %110 = arith.cmpi sgt, %arg1, %c0_i32_50 : i32
    %111 = arith.extui %110 : i1 to i32
    %c0_i32_51 = arith.constant 0 : i32
    %112 = arith.cmpi ne, %111, %c0_i32_51 : i32
    scf.if %112 {
      %c0_52 = arith.constant 0 : index
      %c0_53 = arith.constant 0 : index
      %c0_54 = arith.constant 0 : index
      %113 = vector.load %arg15[%c0_52, %c0_53, %c0_54] : memref<1x1x1024xf32, #tpu.memory_space<vmem>>, vector<1x1x1024xf32>
      %114 = vector.shape_cast %113 : vector<1x1x1024xf32> to vector<1x1024xf32>
      %115 = arith.maximumf %114, %106 : vector<1x1024xf32>
      %c0_55 = arith.constant 0 : index
      %c0_56 = arith.constant 0 : index
      %c0_57 = arith.constant 0 : index
      %116 = vector.load %arg15[%c0_55, %c0_56, %c0_57] : memref<1x1x1024xf32, #tpu.memory_space<vmem>>, vector<1x1x1024xf32>
      %117 = vector.shape_cast %116 : vector<1x1x1024xf32> to vector<1x1024xf32>
      %118 = vector.shape_cast %115 : vector<1x1024xf32> to vector<1x1x1024xf32>
      tpu.vector_store %arg15[%c0_55, %c0_56, %c0_57], %118 {strides = array<i32>} : memref<1x1x1024xf32, #tpu.memory_space<vmem>>, vector<1x1x1024xf32>,
    } else {
    }
    return
  }
  func.func @transform_0(%arg0: i32, %arg1: i32) -> (i32, i32, i32) {
    %c0_i32 = arith.constant 0 : i32
    %c0_i32_0 = arith.constant 0 : i32
    return %arg0, %arg1, %c0_i32 : i32, i32, i32
  }
  func.func @transform_1(%arg0: i32, %arg1: i32) -> (i32, i32) {
    %c0_i32 = arith.constant 0 : i32
    %c0_i32_0 = arith.constant 0 : i32
    %c0_i32_1 = arith.constant 0 : i32
    return %c0_i32, %c0_i32_0 : i32, i32
  }
  func.func @transform_2(%arg0: i32, %arg1: i32) -> (i32, i32) {
    %c0_i32 = arith.constant 0 : i32
    %c0_i32_0 = arith.constant 0 : i32
    %c0_i32_1 = arith.constant 0 : i32
    return %c0_i32, %c0_i32_0 : i32, i32
  }
  func.func @transform_3(%arg0: i32, %arg1: i32) -> (i32, i32) {
    %c0_i32 = arith.constant 0 : i32
    %c0_i32_0 = arith.constant 0 : i32
    %c0_i32_1 = arith.constant 0 : i32
    return %c0_i32, %c0_i32_0 : i32, i32
  }
  func.func @transform_4(%arg0: i32, %arg1: i32) -> (i32, i32) {
    %c0_i32 = arith.constant 0 : i32
    %c0_i32_0 = arith.constant 0 : i32
    %c0_i32_1 = arith.constant 0 : i32
    return %c0_i32, %c0_i32_0 : i32, i32
  }
  func.func @transform_5(%arg0: i32, %arg1: i32) -> (i32, i32) {
    %c0_i32 = arith.constant 0 : i32
    %c0_i32_0 = arith.constant 0 : i32
    %c0_i32_1 = arith.constant 0 : i32
    return %c0_i32, %c0_i32_0 : i32, i32
  }
  func.func @transform_6(%arg0: i32, %arg1: i32) -> (i32, i32) {
    %c0_i32 = arith.constant 0 : i32
    %c0_i32_0 = arith.constant 0 : i32
    %c0_i32_1 = arith.constant 0 : i32
    return %c0_i32, %c0_i32_0 : i32, i32
  }
  func.func @transform_7(%arg0: i32, %arg1: i32) -> (i32, i32) {
    %c0_i32 = arith.constant 0 : i32
    %c0_i32_0 = arith.constant 0 : i32
    %c0_i32_1 = arith.constant 0 : i32
    return %c0_i32, %c0_i32_0 : i32, i32
  }
  func.func @transform_8(%arg0: i32, %arg1: i32) -> (i32, i32) {
    %c0_i32 = arith.constant 0 : i32
    %c0_i32_0 = arith.constant 0 : i32
    %c0_i32_1 = arith.constant 0 : i32
    return %c0_i32, %c0_i32_0 : i32, i32
  }
  func.func @transform_9(%arg0: i32, %arg1: i32) -> (i32, i32) {
    %c0_i32 = arith.constant 0 : i32
    %c0_i32_0 = arith.constant 0 : i32
    %c0_i32_1 = arith.constant 0 : i32
    return %c0_i32, %c0_i32_0 : i32, i32
  }
  func.func @transform_10(%arg0: i32, %arg1: i32) -> (i32, i32) {
    %c0_i32 = arith.constant 0 : i32
    %c0_i32_0 = arith.constant 0 : i32
    %c0_i32_1 = arith.constant 0 : i32
    return %c0_i32, %c0_i32_0 : i32, i32
  }
  func.func @transform_11(%arg0: i32, %arg1: i32) -> (i32, i32) {
    %c0_i32 = arith.constant 0 : i32
    %c0_i32_0 = arith.constant 0 : i32
    %c0_i32_1 = arith.constant 0 : i32
    return %c0_i32, %c0_i32_0 : i32, i32
  }
  func.func @transform_12(%arg0: i32, %arg1: i32) -> (i32, i32) {
    %c0_i32 = arith.constant 0 : i32
    %c0_i32_0 = arith.constant 0 : i32
    %c0_i32_1 = arith.constant 0 : i32
    return %c0_i32, %c0_i32_0 : i32, i32
  }
  func.func @transform_13(%arg0: i32, %arg1: i32) -> (i32, i32, i32) {
    %c0_i32 = arith.constant 0 : i32
    %c0_i32_0 = arith.constant 0 : i32
    %c0_i32_1 = arith.constant 0 : i32
    return %arg0, %c0_i32, %c0_i32_0 : i32, i32, i32
  }
}

</mosaic_0001>

<bundles_post_ra>
// kernel: tpu_custom_call.1
= control target key start
LH: loop header
LB: loop body
LE: loop exit
PB: predicated region body
PF: predicated region fallthrough
CT: control target
= control target key end

     0   :  { %s3979_s0 = inlined_call_operand.hbm [shape: bf16[2,48,4], index: 0, kind: input, shape index: {}]   ;;  %s3980_s1 = inlined_call_operand.hbm [shape: bf16[4,64], index: 1, kind: input, shape index: {}]   ;;  %s3981_s2 = inlined_call_operand.hbm [shape: f32[1,64], index: 2, kind: input, shape index: {}]   ;;  %s3982_s3 = inlined_call_operand.hbm [shape: f32[1,64], index: 3, kind: input, shape index: {}]   ;;  %s3983_s4 = inlined_call_operand.hbm [shape: f32[1,64], index: 4, kind: input, shape index: {}]   ;;  %s3984_s5 = inlined_call_operand.hbm [shape: bf16[64,128], index: 5, kind: input, shape index: {}]   ;;  %s3985_s6 = inlined_call_operand.hbm [shape: f32[1,128], index: 6, kind: input, shape index: {}]   ;;  %s3986_s7 = inlined_call_operand.hbm [shape: f32[1,128], index: 7, kind: input, shape index: {}]   ;;  %s3987_s8 = inlined_call_operand.hbm [shape: f32[1,128], index: 8, kind: input, shape index: {}]   ;;  %s3988_s9 = inlined_call_operand.hbm [shape: bf16[128,1024], index: 9, kind: input, shape index: {}]   ;;  %s3989_s10 = inlined_call_operand.hbm [shape: f32[1,1024], index: 10, kind: input, shape index: {}]   ;;  %s3990_s11 = inlined_call_operand.hbm [shape: bf16[1,1024], index: 11, kind: input, shape index: {}]   ;;  %s3991_s12 = inlined_call_operand.hbm [shape: bf16[1,1024], index: 12, kind: input, shape index: {}]   ;;  %s3992_s13 = inlined_call_operand.hbm [shape: f32[2,1,1024], index: 13, kind: output, shape index: {}]  }
   0x1   :  { %4011 = sst [smem:[#allocation42_spill]] %s3979_s0 }
   0x2   :  { %4012 = sst [smem:[#allocation43_spill]] %s3980_s1 }
   0x3   :  { %4013 = sst [smem:[#allocation44_spill]] %s3981_s2 }
   0x4   :  { %4014 = sst [smem:[#allocation45_spill]] %s3982_s3 }
   0x5   :  { %4015 = sst [smem:[#allocation46_spill]] %s3983_s4 }
   0x6   :  { %4016 = sst [smem:[#allocation47_spill]] %s3984_s5 }
   0x7   :  { %4017 = sst [smem:[#allocation48_spill]] %s3985_s6 }
   0x8   :  { %4018 = sst [smem:[#allocation49_spill]] %s3992_s13 }
   0x9   :  { %18 = vsyncpa [#allocation3], 0 }
   0xa   :  { %20 = vsyncpa [#allocation3 + $0x1], 0 }
   0xb   :  { %21 = vsyncpa [#allocation6], 0 }
   0xc   :  { %22 = vsyncpa [#allocation9], 0 }
   0xd   :  { %23 = vsyncpa [#allocation12], 0 }
   0xe   :  { %24 = vsyncpa [#allocation15], 0 }
   0xf   :  { %25 = vsyncpa [#allocation18], 0 }
  0x10   :  { %26 = vsyncpa [#allocation21], 0 }
  0x11   :  { %27 = vsyncpa [#allocation4], 0 }
  0x12   :  { %29 = vsyncpa [#allocation4 + $0x1], 0  ;;  %s3234_s25 = smov 0   ;;  %s3236_s26 = smov 0  }
  0x13   :  { %s3238_s27 = smov 0   ;;  %s3240_s28 = smov 0  }
  0x14   :  { %s3242_s29 = smov 0   ;;  %s3244_s30 = smov 0  }
  0x15   :  { %s3246_s14 = smov 0   ;;  %s3248_s15 = smov 0  }
  0x16   :  { %s3250_s16 = smov 0   ;;  %s3252_s17 = smov 0  }
  0x17   :  { %s3254_s18 = smov 0  }
  0x18 LB: > { %4019 = sst [smem:[#allocation32_spill]] %s3100_s25  ;;  %s3994_s19 = sadd.s32 4294967295, %s3140_s18   ;;  %s3140_s18 = sphi %s3254_s18, %s35_s18   ;;  %s3136_s17 = sphi %s3252_s17, %s4082_s17   ;;  %s3132_s16 = sphi %s3250_s16, %s4081_s16   ;;  %s3128_s15 = sphi %s3248_s15, %s4080_s15   ;;  %s3124_s14 = sphi %s3246_s14, %s4079_s14   ;;  %s3120_s30 = sphi %s3244_s30, %s4078_s30   ;;  %s3116_s29 = sphi %s3242_s29, %s4075_s29   ;;  %s3112_s28 = sphi %s3240_s28, %s4074_s28   ;;  %s3108_s27 = sphi %s3238_s27, %s4077_s27   ;;  %s3104_s26 = sphi %s3236_s26, %s4073_s26   ;;  %s3100_s25 = sphi %s3234_s25, %s4072_s25  }
  0x19   : > { %4020 = sst [smem:[#allocation33_spill]] %s3104_s26  ;;  %p2235_p0 = scmp.ge.s32.totalorder %s3140_s18, 1 }
  0x1a   : > { %4021 = sst [smem:[#allocation34_spill]] %s3108_s27  ;;  %p3293_p1 = scmp.eq.s32.totalorder %s3994_s19, 0 }
  0x1b   : > { %4022 = sst [smem:[#allocation35_spill]] %s3112_s28  ;;  %p358_p2 = scmp.lt.s32.totalorder %s3140_s18, 7 }
  0x1c   : > { %4023 = sst [smem:[#allocation36_spill]] %s3116_s29  ;;  %s3142_s22 = smov [#allocation5]  }
  0x1d   : > { %4024 = sst [smem:[#allocation37_spill]] %s3120_s30  ;;  %p3298_p3 = pnand %p2235_p0, %p358_p2 }
  0x1e   : > { %4025 = sst [smem:[#allocation38_spill]] %s3124_s14  ;;  %s371_s23 = sshll.u32 %s3142_s22, 4  ;;  %s372_s23 = int_to_ptr.vmem [resolvable:$true] %s371_s23 }
  0x1f   : > { %4026 = sst [smem:[#allocation39_spill]] %s3128_s15  ;;  %p2430_p4 = pneg %p3298_p3 }
  0x20   : > { %s4027_s20 = scalar_select %p3293_p1, 1, 0 }
  0x21   : > { %s4029_s21 = scalar_select %p3298_p3, 1, 0 }
  0x22   : > { %4028 = sst [smem:[#allocation40_spill]] %s4027_s20  ;;  %s3143_s24 = smov [#allocation8]  }
  0x23   : > { %4030 = sst [smem:[#allocation41_spill]] %s4029_s21  ;;  %s393_s13 = sshll.u32 %s3143_s24, 4  ;;  %s3310_s13 = int_to_ptr.vmem [resolvable:$true] %s393_s13 }
  0x24   : > { %p3306_p5 = pnand %p2430_p4, %p3293_p1  ;;  %s3144_s15 = smov [#allocation11]  }
  0x25   : > { %s414_s14 = sshll.u32 %s3144_s15, 4  ;;  %s4032_s1 = sld [smem:[#allocation43_spill]]  ;;  %s3312_s14 = int_to_ptr.vmem [resolvable:$true] %s414_s14 }
  0x26   : > { %p3322_p7 = pneg %p3306_p5 }
  0x2b   : > { %s2628_s22 = scalar_lea.hbm %s4032_s1, 32 }
  0x2c   : > { %p2629_p6 = scmp.ne.s32.totalorder %s4032_s1, %s2628_s22  ;;  %p2635_p10 = scmp.lt.u32.totalorder %s2628_s22, %s4032_s1 }
  0x2e   : > { %p2631_p8 = pnand %p3322_p7, %p2629_p6 }
  0x30   : > { %p2632_p9 = pneg %p2631_p8 }
  0x32   : > { %p2637_p11 = pnand %p2635_p10, %p2632_p9 }
  0x34   : > { %2640 = shalt.err (!%p2637_p11)
}
  0x35   : > { %s2641_s0 = scalar_lea.vmem %s372_s23, 32  ;;  %p2649_p2 = scmp.lt.s32.totalorder %s372_s23, %s372_s23 }
  0x36   : > { %p2642_p12 = scmp.ne.s32.totalorder %s372_s23, %s2641_s0  ;;  %p2650_p4 = scmp.lt.s32.totalorder %s2641_s0, %s2641_s0 }
  0x38   : > { %p2644_p13 = pnand %p2642_p12, %p3322_p7  ;;  %p2651_p3 = por %p2650_p4, %p2649_p2 }
  0x3a   : > { %p2645_p0 = pneg %p2644_p13 }
  0x3c   : > { %p2652_p1 = pnand %p2651_p3, %p2645_p0 }
  0x3e   : > { %2655 = shalt.err (!%p2652_p1)
}
  0x3f   : > { %2433 = dma.hbm_to_vmem [thread:$0]  (!%p3306_p5), %s4032_s1, 32, %s372_s23, [#allocation6]  }
  0x40   : > { %s4034_s3 = sld [smem:[#allocation45_spill]] }
  0x46   : > { %s2656_s22 = scalar_lea.hbm %s4034_s3, 16 }
  0x47   : > { %p2657_p6 = scmp.ne.s32.totalorder %s4034_s3, %s2656_s22  ;;  %p2663_p1 = scmp.lt.u32.totalorder %s2656_s22, %s4034_s3 }
  0x49   : > { %p2659_p8 = pnand %p2657_p6, %p3322_p7 }
  0x4b   : > { %p2660_p9 = pneg %p2659_p8 }
  0x4d   : > { %p2665_p3 = pnand %p2663_p1, %p2660_p9 }
  0x4f   : > { %2668 = shalt.err (!%p2665_p3)
}
  0x50   : > { %s2669_s23 = scalar_lea.vmem %s3310_s13, 16  ;;  %s2676_s27 = scalar_lea.vmem %s3310_s13, 32 }
  0x51   : > { %p2670_p10 = scmp.ne.s32.totalorder %s3310_s13, %s2669_s23  ;;  %p2677_p13 = scmp.lt.s32.totalorder %s3310_s13, %s3310_s13 }
  0x52   : > { %p2678_p0 = scmp.lt.s32.totalorder %s2676_s27, %s2669_s23 }
  0x53   : > { %p2672_p11 = pnand %p2670_p10, %p3322_p7 }
  0x54   : > { %p2679_p2 = por %p2678_p0, %p2677_p13 }
  0x55   : > { %p2673_p12 = pneg %p2672_p11 }
  0x57   : > { %p2680_p4 = pnand %p2679_p2, %p2673_p12 }
  0x59   : > { %2683 = shalt.err (!%p2680_p4)
}
  0x5a   : > { %2439 = dma.hbm_to_vmem [thread:$0]  (!%p3306_p5), %s4034_s3, 16, %s3310_s13, [#allocation9]  }
  0x5b   : > { %s4035_s5 = sld [smem:[#allocation47_spill]] }
  0x61   : > { %s2684_s21 = scalar_lea.hbm %s4035_s5, 512 }
  0x62   : > { %p2685_p6 = scmp.ne.s32.totalorder %s4035_s5, %s2684_s21  ;;  %p2691_p1 = scmp.lt.u32.totalorder %s2684_s21, %s4035_s5 }
  0x64   : > { %p2687_p8 = pnand %p2685_p6, %p3322_p7 }
  0x66   : > { %p2688_p9 = pneg %p2687_p8 }
  0x68   : > { %p2693_p3 = pnand %p2691_p1, %p2688_p9 }
  0x6a   : > { %2696 = shalt.err (!%p2693_p3)
}
  0x6b   : > { %s2697_s13 = scalar_lea.vmem %s3312_s14, 512  ;;  %p2705_p13 = scmp.lt.s32.totalorder %s3312_s14, %s3312_s14 }
  0x6c   : > { %p2698_p10 = scmp.ne.s32.totalorder %s3312_s14, %s2697_s13  ;;  %p2706_p0 = scmp.lt.s32.totalorder %s2697_s13, %s2697_s13 }
  0x6e   : > { %p2700_p11 = pnand %p2698_p10, %p3322_p7  ;;  %p2707_p2 = por %p2706_p0, %p2705_p13 }
  0x70   : > { %p2701_p12 = pneg %p2700_p11 }
  0x72   : > { %p2708_p4 = pnand %p2707_p2, %p2701_p12 }
  0x74   : > { %2711 = shalt.err (!%p2708_p4)
}
  0x75   : > { %s4007_s27 = smov 64   ;;  %s4008_s28 = smov 4  }
  0x76   : > { %2445 = dma.hbm_to_vmem [thread:$0]  (!%p3306_p5), %s4035_s5, 512, %s3312_s14, [#allocation12], %s4007_s27, %s4007_s27, %s4008_s28  }
  0x77   : > { %s3147_s20 = smov [#allocation14]   ;;  %s3148_s22 = smov [#allocation17]  }
  0x78   : > { %s439_s21 = sshll.u32 %s3147_s20, 4  ;;  %s460_s15 = sshll.u32 %s3148_s22, 4  ;;  %s440_s21 = int_to_ptr.vmem [resolvable:$true] %s439_s21  ;;  %s461_s15 = int_to_ptr.vmem [resolvable:$true] %s460_s15 }
  0x79   : > { %s2712_s13 = scalar_lea.hbm %s3986_s7, 16 }
  0x7a   : > { %p2713_p6 = scmp.ne.s32.totalorder %s3986_s7, %s2712_s13  ;;  %p2719_p1 = scmp.lt.u32.totalorder %s2712_s13, %s3986_s7 }
  0x7c   : > { %p2715_p8 = pnand %p2713_p6, %p3322_p7 }
  0x7e   : > { %p2716_p9 = pneg %p2715_p8 }
  0x80   : > { %p2721_p3 = pnand %p2719_p1, %p2716_p9 }
  0x82   : > { %2724 = shalt.err (!%p2721_p3)
}
  0x83   : > { %s2725_s14 = scalar_lea.vmem %s440_s21, 16  ;;  %s2732_s25 = scalar_lea.vmem %s440_s21, 32 }
  0x84   : > { %p2726_p10 = scmp.ne.s32.totalorder %s440_s21, %s2725_s14  ;;  %p2733_p13 = scmp.lt.s32.totalorder %s440_s21, %s440_s21 }
  0x85   : > { %p2734_p0 = scmp.lt.s32.totalorder %s2732_s25, %s2725_s14 }
  0x86   : > { %p2728_p11 = pnand %p2726_p10, %p3322_p7 }
  0x87   : > { %p2735_p2 = por %p2734_p0, %p2733_p13 }
  0x88   : > { %p2729_p12 = pneg %p2728_p11 }
  0x8a   : > { %p2736_p4 = pnand %p2735_p2, %p2729_p12 }
  0x8c   : > { %2739 = shalt.err (!%p2736_p4)
}
  0x8d   : > { %2451 = dma.hbm_to_vmem [thread:$0]  (!%p3306_p5), %s3986_s7, 16, %s440_s21, [#allocation15]  }
  0x8e   : > { %s2740_s26 = scalar_lea.hbm %s3988_s9, 8192 }
  0x8f   : > { %p2741_p6 = scmp.ne.s32.totalorder %s3988_s9, %s2740_s26  ;;  %p2747_p1 = scmp.lt.u32.totalorder %s2740_s26, %s3988_s9 }
  0x91   : > { %p2743_p8 = pnand %p2741_p6, %p3322_p7 }
  0x93   : > { %p2744_p9 = pneg %p2743_p8 }
  0x95   : > { %p2749_p3 = pnand %p2747_p1, %p2744_p9 }
  0x97   : > { %2752 = shalt.err (!%p2749_p3)
}
  0x98   : > { %s2753_s13 = scalar_lea.vmem %s461_s15, 8192  ;;  %p2761_p13 = scmp.lt.s32.totalorder %s461_s15, %s461_s15 }
  0x99   : > { %p2754_p10 = scmp.ne.s32.totalorder %s461_s15, %s2753_s13  ;;  %p2762_p0 = scmp.lt.s32.totalorder %s2753_s13, %s2753_s13 }
  0x9b   : > { %p2756_p11 = pnand %p2754_p10, %p3322_p7  ;;  %p2763_p2 = por %p2762_p0, %p2761_p13 }
  0x9d   : > { %p2757_p12 = pneg %p2756_p11 }
  0x9f   : > { %p2764_p4 = pnand %p2763_p2, %p2757_p12 }
  0xa1   : > { %2767 = shalt.err (!%p2764_p4)
}
  0xa2   : > { %s3149_s21 = smov 512   ;;  %s3150_s14 = smov 32  }
  0xa3   : > { %2457 = dma.hbm_to_vmem [thread:$0]  (!%p3306_p5), %s3988_s9, 8192, %s461_s15, [#allocation18], %s3149_s21, %s3149_s21, %s3150_s14  }
  0xa4   : > { %s3151_s3 = smov [#allocation20]   ;;  %s3152_s30 = smov [#allocation7]  }
  0xa5   : > { %s485_s29 = sshll.u32 %s3151_s3, 4  ;;  %s382_s26 = sshll.u32 %s3152_s30, 4  ;;  %s486_s29 = int_to_ptr.vmem [resolvable:$true] %s485_s29  ;;  %s383_s26 = int_to_ptr.vmem [resolvable:$true] %s382_s26 }
  0xa6   : > { %s2768_s0 = scalar_lea.hbm %s3990_s11, 128 }
  0xa7   : > { %p2769_p6 = scmp.ne.s32.totalorder %s3990_s11, %s2768_s0  ;;  %p2775_p1 = scmp.lt.u32.totalorder %s2768_s0, %s3990_s11 }
  0xa9   : > { %p2771_p8 = pnand %p2769_p6, %p3322_p7 }
  0xab   : > { %p2772_p9 = pneg %p2771_p8 }
  0xad   : > { %p2777_p3 = pnand %p2775_p1, %p2772_p9 }
  0xaf   : > { %2780 = shalt.err (!%p2777_p3)
}
  0xb0   : > { %s2781_s15 = scalar_lea.vmem %s486_s29, 128  ;;  %p2789_p13 = scmp.lt.s32.totalorder %s486_s29, %s486_s29 }
  0xb1   : > { %p2782_p10 = scmp.ne.s32.totalorder %s486_s29, %s2781_s15  ;;  %p2790_p0 = scmp.lt.s32.totalorder %s2781_s15, %s2781_s15 }
  0xb3   : > { %p2784_p11 = pnand %p2782_p10, %p3322_p7  ;;  %p2791_p2 = por %p2790_p0, %p2789_p13 }
  0xb5   : > { %p2785_p12 = pneg %p2784_p11 }
  0xb7   : > { %p2792_p4 = pnand %p2791_p2, %p2785_p12 }
  0xb9   : > { %2795 = shalt.err (!%p2792_p4)
}
  0xba   : > { %2463 = dma.hbm_to_vmem [thread:$0]  (!%p3306_p5), %s3990_s11, 128, %s486_s29, [#allocation21]  }
  0xbb   : > { %s4036_s2 = sld [smem:[#allocation44_spill]] }
  0xc1   : > { %s2796_s25 = scalar_lea.hbm %s4036_s2, 16 }
  0xc2   : > { %p2797_p6 = scmp.ne.s32.totalorder %s4036_s2, %s2796_s25  ;;  %p2803_p1 = scmp.lt.u32.totalorder %s2796_s25, %s4036_s2 }
  0xc4   : > { %p2799_p8 = pnand %p2797_p6, %p3322_p7 }
  0xc6   : > { %p2800_p9 = pneg %p2799_p8 }
  0xc8   : > { %p2805_p3 = pnand %p2803_p1, %p2800_p9 }
  0xca   : > { %2808 = shalt.err (!%p2805_p3)
}
  0xcb   : > { %s2809_s22 = scalar_lea.vmem %s383_s26, 16  ;;  %s2816_s29 = scalar_lea.vmem %s383_s26, 32 }
  0xcc   : > { %p2810_p10 = scmp.ne.s32.totalorder %s383_s26, %s2809_s22  ;;  %p2817_p13 = scmp.lt.s32.totalorder %s383_s26, %s383_s26 }
  0xcd   : > { %p2818_p0 = scmp.lt.s32.totalorder %s2816_s29, %s2809_s22 }
  0xce   : > { %p2812_p11 = pnand %p2810_p10, %p3322_p7 }
  0xcf   : > { %p2819_p2 = por %p2818_p0, %p2817_p13 }
  0xd0   : > { %p2813_p12 = pneg %p2812_p11 }
  0xd2   : > { %p2820_p4 = pnand %p2819_p2, %p2813_p12 }
  0xd4   : > { %2823 = shalt.err (!%p2820_p4)
}
  0xd5   : > { %2436 = dma.hbm_to_vmem [thread:$0]  (!%p3306_p5), %s4036_s2, 16, %s383_s26, [#allocation6]  }
  0xd6   : > { %s3153_s13 = smov [#allocation10]   ;;  %s3154_s21 = smov [#allocation13]  }
  0xd7   : > { %s404_s15 = sshll.u32 %s3153_s13, 4  ;;  %s428_s14 = sshll.u32 %s3154_s21, 4  ;;  %s405_s15 = int_to_ptr.vmem [resolvable:$true] %s404_s15  ;;  %s429_s14 = int_to_ptr.vmem [resolvable:$true] %s428_s14 }
  0xd8   : > { %s4037_s4 = sld [smem:[#allocation46_spill]] }
  0xde   : > { %s2824_s25 = scalar_lea.hbm %s4037_s4, 16 }
  0xdf   : > { %p2825_p6 = scmp.ne.s32.totalorder %s4037_s4, %s2824_s25  ;;  %p2831_p1 = scmp.lt.u32.totalorder %s2824_s25, %s4037_s4 }
  0xe1   : > { %p2827_p8 = pnand %p2825_p6, %p3322_p7 }
  0xe3   : > { %p2828_p9 = pneg %p2827_p8 }
  0xe5   : > { %p2833_p3 = pnand %p2831_p1, %p2828_p9 }
  0xe7   : > { %2836 = shalt.err (!%p2833_p3)
}
  0xe8   : > { %s2837_s26 = scalar_lea.vmem %s405_s15, 16  ;;  %s2844_s22 = scalar_lea.vmem %s405_s15, 32 }
  0xe9   : > { %p2838_p10 = scmp.ne.s32.totalorder %s405_s15, %s2837_s26  ;;  %p2845_p13 = scmp.lt.s32.totalorder %s405_s15, %s405_s15 }
  0xea   : > { %p2846_p0 = scmp.lt.s32.totalorder %s2844_s22, %s2837_s26 }
  0xeb   : > { %p2840_p11 = pnand %p2838_p10, %p3322_p7 }
  0xec   : > { %p2847_p2 = por %p2846_p0, %p2845_p13 }
  0xed   : > { %p2841_p12 = pneg %p2840_p11 }
  0xef   : > { %p2848_p4 = pnand %p2847_p2, %p2841_p12 }
  0xf1   : > { %2851 = shalt.err (!%p2848_p4)
}
  0xf2   : > { %2442 = dma.hbm_to_vmem [thread:$0]  (!%p3306_p5), %s4037_s4, 16, %s405_s15, [#allocation9]  }
  0xf3   : > { %s4038_s6 = sld [smem:[#allocation48_spill]] }
  0xf9   : > { %s2852_s21 = scalar_lea.hbm %s4038_s6, 16 }
  0xfa   : > { %p2853_p6 = scmp.ne.s32.totalorder %s4038_s6, %s2852_s21  ;;  %p2859_p1 = scmp.lt.u32.totalorder %s2852_s21, %s4038_s6 }
  0xfc   : > { %p2855_p8 = pnand %p2853_p6, %p3322_p7 }
  0xfe   : > { %p2856_p9 = pneg %p2855_p8 }
 0x100   : > { %p2861_p3 = pnand %p2859_p1, %p2856_p9 }
 0x102   : > { %2864 = shalt.err (!%p2861_p3)
}
 0x103   : > { %s2865_s3 = scalar_lea.vmem %s429_s14, 16  ;;  %s2872_s15 = scalar_lea.vmem %s429_s14, 32 }
 0x104   : > { %p2866_p10 = scmp.ne.s32.totalorder %s429_s14, %s2865_s3  ;;  %p2873_p13 = scmp.lt.s32.totalorder %s429_s14, %s429_s14 }
 0x105   : > { %p2874_p0 = scmp.lt.s32.totalorder %s2872_s15, %s2865_s3 }
 0x106   : > { %p2868_p11 = pnand %p2866_p10, %p3322_p7 }
 0x107   : > { %p2875_p2 = por %p2874_p0, %p2873_p13 }
 0x108   : > { %p2869_p12 = pneg %p2868_p11 }
 0x10a   : > { %p2876_p4 = pnand %p2875_p2, %p2869_p12 }
 0x10c   : > { %2879 = shalt.err (!%p2876_p4)
}
 0x10d   : > { %2448 = dma.hbm_to_vmem [thread:$0]  (!%p3306_p5), %s4038_s6, 16, %s429_s14, [#allocation12]  }
 0x10e   : > { %s3155_s26 = smov [#allocation16]   ;;  %s3156_s29 = smov [#allocation19]  }
 0x10f   : > { %s450_s22 = sshll.u32 %s3155_s26, 4  ;;  %s474_s0 = sshll.u32 %s3156_s29, 4  ;;  %s451_s22 = int_to_ptr.vmem [resolvable:$true] %s450_s22  ;;  %s475_s0 = int_to_ptr.vmem [resolvable:$true] %s474_s0 }
 0x110   : > { %s2880_s21 = scalar_lea.hbm %s3987_s8, 16 }
 0x111   : > { %p2881_p6 = scmp.ne.s32.totalorder %s3987_s8, %s2880_s21  ;;  %p2887_p1 = scmp.lt.u32.totalorder %s2880_s21, %s3987_s8 }
 0x113   : > { %p2883_p8 = pnand %p2881_p6, %p3322_p7 }
 0x115   : > { %p2884_p9 = pneg %p2883_p8 }
 0x117   : > { %p2889_p3 = pnand %p2887_p1, %p2884_p9 }
 0x119   : > { %2892 = shalt.err (!%p2889_p3)
}
 0x11a   : > { %s2893_s14 = scalar_lea.vmem %s451_s22, 16  ;;  %s2900_s3 = scalar_lea.vmem %s451_s22, 32 }
 0x11b   : > { %p2894_p10 = scmp.ne.s32.totalorder %s451_s22, %s2893_s14  ;;  %p2901_p13 = scmp.lt.s32.totalorder %s451_s22, %s451_s22 }
 0x11c   : > { %p2902_p0 = scmp.lt.s32.totalorder %s2900_s3, %s2893_s14 }
 0x11d   : > { %p2896_p11 = pnand %p2894_p10, %p3322_p7 }
 0x11e   : > { %p2903_p2 = por %p2902_p0, %p2901_p13 }
 0x11f   : > { %p2897_p12 = pneg %p2896_p11 }
 0x121   : > { %p2904_p4 = pnand %p2903_p2, %p2897_p12 }
 0x123   : > { %2907 = shalt.err (!%p2904_p4)
}
 0x124   : > { %2454 = dma.hbm_to_vmem [thread:$0]  (!%p3306_p5), %s3987_s8, 16, %s451_s22, [#allocation15]  }
 0x125   : > { %s2908_s29 = scalar_lea.hbm %s3989_s10, 128 }
 0x126   : > { %p2909_p6 = scmp.ne.s32.totalorder %s3989_s10, %s2908_s29  ;;  %p2915_p1 = scmp.lt.u32.totalorder %s2908_s29, %s3989_s10 }
 0x128   : > { %p2911_p8 = pnand %p2909_p6, %p3322_p7 }
 0x12a   : > { %p2912_p9 = pneg %p2911_p8 }
 0x12c   : > { %p2917_p3 = pnand %p2915_p1, %p2912_p9 }
 0x12e   : > { %2920 = shalt.err (!%p2917_p3)
}
 0x12f   : > { %s2921_s28 = scalar_lea.vmem %s475_s0, 128  ;;  %p2929_p13 = scmp.lt.s32.totalorder %s475_s0, %s475_s0 }
 0x130   : > { %p2922_p10 = scmp.ne.s32.totalorder %s475_s0, %s2921_s28  ;;  %p2930_p0 = scmp.lt.s32.totalorder %s2921_s28, %s2921_s28 }
 0x132   : > { %p2924_p11 = pnand %p2922_p10, %p3322_p7  ;;  %p2931_p2 = por %p2930_p0, %p2929_p13 }
 0x134   : > { %p2925_p12 = pneg %p2924_p11 }
 0x136   : > { %p2932_p4 = pnand %p2931_p2, %p2925_p12 }
 0x138   : > { %2935 = shalt.err (!%p2932_p4)
}
 0x139   : > { %2460 = dma.hbm_to_vmem [thread:$0]  (!%p3306_p5), %s3989_s10, 128, %s475_s0, [#allocation18]  }
 0x13a   : > { %s3157_s1 = smov [#allocation22]   ;;  %s2936_s30 = scalar_lea.hbm %s3991_s12, 128 }
 0x13b   : > { %s496_s14 = sshll.u32 %s3157_s1, 4  ;;  %p2937_p6 = scmp.ne.s32.totalorder %s3991_s12, %s2936_s30  ;;  %s497_s14 = int_to_ptr.vmem [resolvable:$true] %s496_s14 }
 0x13c   : > { %p2943_p1 = scmp.lt.u32.totalorder %s2936_s30, %s3991_s12 }
 0x13d   : > { %p2939_p8 = pnand %p2937_p6, %p3322_p7 }
 0x13f   : > { %p2940_p9 = pneg %p2939_p8 }
 0x141   : > { %p2945_p3 = pnand %p2943_p1, %p2940_p9 }
 0x143   : > { %2948 = shalt.err (!%p2945_p3)
}
 0x144   : > { %s2949_s0 = scalar_lea.vmem %s497_s14, 128  ;;  %p2957_p13 = scmp.lt.s32.totalorder %s497_s14, %s497_s14 }
 0x145   : > { %p2950_p10 = scmp.ne.s32.totalorder %s497_s14, %s2949_s0  ;;  %p2958_p0 = scmp.lt.s32.totalorder %s2949_s0, %s2949_s0 }
 0x147   : > { %p2952_p11 = pnand %p2950_p10, %p3322_p7  ;;  %p2959_p2 = por %p2958_p0, %p2957_p13 }
 0x149   : > { %p2953_p12 = pneg %p2952_p11 }
 0x14b   : > { %p2960_p4 = pnand %p2959_p2, %p2953_p12 }
 0x14d   : > { %2963 = shalt.err (!%p2960_p4)
}
 0x14e   : > { %s4039_s27 = sld [smem:[#allocation37_spill]]  ;;  %s4040_s28 = sld [smem:[#allocation36_spill]] }
 0x14f   : > { %s4041_s24 = sld [smem:[#allocation35_spill]]  ;;  %s4042_s22 = sld [smem:[#allocation34_spill]] }
 0x150   : > { %2466 = dma.hbm_to_vmem [thread:$0]  (!%p3306_p5), %s3991_s12, 128, %s497_s14, [#allocation21]  }
 0x151   : > { %s4043_s25 = sld [smem:[#allocation40_spill]]  ;;  %s2234_s1 = sadd.s32 4294967294, %s3140_s18  }
 0x152   : > { %s4044_s3 = sld [smem:[#allocation33_spill]]  ;;  %s44_s19 = sadd.s32 1, %s3132_s16 }
 0x153   : > { %p45_p7 = scmp.ge.s32.totalorder %s44_s19, 3  ;;  %s47_s15 = sadd.s32 1, %s3136_s17 }
 0x154   : > { %s56_s30 = sadd.s32 1, %s4039_s27  ;;  %p63_p6 = scmp.ne.s32.totalorder %s4039_s27, %s4040_s28 }
 0x155   : > { %s4084_s19 = smov (%p45_p7, %s44_s19), 0  ;;  %s4086_s15 = smov (!%p45_p7, %s47_s15), %s3136_s17 }
 0x156   : > { %s52_s20 = ssub.s32 %s3132_s16, %s4084_s19  ;;  %p64_p8 = scmp.eq.s32.totalorder %s3140_s18, 0 }
 0x157   : > { %s4045_s14 = sld [smem:[#allocation32_spill]]  ;;  %p49_p5 = scmp.ge.s32.totalorder %s4086_s15, 2 }
 0x158   : > { %p69_p9 = scmp.ne.s32.totalorder %s4040_s28, %s4041_s24  ;;  %p3564_p1 = por %p64_p8, %p63_p6 }
 0x159   : > { %s334_s29 = sadd.s32 1, %s4042_s22  ;;  %s4088_s15 = smov (%p49_p5, %s4086_s15), 0 }
 0x15a   : > { %p4047_p3 = scmp.ne.s32.totalorder %s4043_s25, 0  ;;  %p344_p11 = scmp.ne.s32.totalorder %s4042_s22, %s4044_s3 }
 0x15b   : > { %s51_s0 = ssub.s32 %s3136_s17, %s4088_s15  ;;  %s4049_s13 = sadd.s32 4294967295, %s3140_s18  }
 0x15c   : > { %p3573_p10 = por %p4047_p3, %p69_p9  ;;  %p345_p12 = scmp.eq.s32.totalorder %s4049_s13, 5 }
 0x15d   : > { %s53_s21 = sor.u32 %s52_s20, %s51_s0  ;;  %p332_p13 = scmp.eq.s32.totalorder %s51_s0, 0 }
 0x15e   : > { %p54_p0 = scmp.eq.s32.totalorder %s53_s21, 0  ;;  %p3583_p2 = por %p345_p12, %p344_p11 }
 0x15f   : > { %s4090_s22 = smov (!%p332_p13, %s4042_s22), %s334_s29  ;;  %p350_p4 = scmp.ne.s32.totalorder %s4044_s3, %s4045_s14 }
 0x160   : > { %s4050_s28 = scalar_select %p3583_p2, 1, 0 }
 0x161   : > { %s3591_s24 = scalar_select %p54_p0, %s4039_s27, %s56_s30  }
 0x162   : > { %p351_p7 = scmp.eq.s32.totalorder %s2234_s1, 5  ;;  %p2487_p6 = scmp.lt.s32.totalorder %s3140_s18, 6 }
 0x163   : > { %s507_s25 = sand.u32 1, %s4039_s27   ;;  %s2250_s13 = sshll.u32 %s3132_s16, 1 }
 0x164   : > { %p3597_p8 = por %p351_p7, %p350_p4  ;;  %s2249_s20 = sshll.u32 %s507_s25, 3 }
 0x165   : > { %s2377_s0 = smul.u32 6, %s3136_s17  ;;  %s511_s21 = scalar_lea.vmem [#allocation2], %s2249_s20 }
 0x166   : > { %s4051_s2 = scalar_select %p3597_p8, 1, 0 }
 0x167   : > { %s520_s4 = sshll.u32 %s511_s21, 4  ;;  %p3605_p5 = pnand %p2487_p6, %p3564_p1  ;;  %s3609_s4 = int_to_ptr.vmem [resolvable:$true] %s520_s4 }
 0x168   : > { %s517_s3 = sadd.s32 %s2377_s0, %s2250_s13  ;;  %s4053_s14 = sld [smem:[#allocation42_spill]] }
 0x169   : > { %s2251_s27 = sshll.u32 %s517_s3, 6  ;;  %s3616_s26 = scalar_lea.sflag [#allocation3], %s507_s25 }
 0x16a   : > { %p2966_p1 = pneg %p3605_p5 }
 0x16e   : > { %s4054_s6 = smov %s4053_s14  ;;  %s3614_s29 = scalar_lea.hbm %s4053_s14, %s2251_s27 }
 0x16f   : > { %s2964_s20 = scalar_lea.hbm %s3614_s29, 128  ;;  %s2969_s21 = scalar_lea.hbm %s4054_s6, 768 }
 0x170   : > { %p2965_p9 = scmp.ne.s32.totalorder %s3614_s29, %s2964_s20  ;;  %p2970_p12 = scmp.lt.u32.totalorder %s3614_s29, %s4054_s6 }
 0x171   : > { %p2971_p13 = scmp.lt.u32.totalorder %s2969_s21, %s2964_s20  ;;  %p2973_p4 = scmp.lt.u32.totalorder %s2964_s20, %s3614_s29 }
 0x172   : > { %p2967_p3 = pnand %p2966_p1, %p2965_p9 }
 0x173   : > { %p2972_p0 = por %p2971_p13, %p2970_p12 }
 0x174   : > { %p2968_p11 = pneg %p2967_p3 }
 0x175   : > { %p2974_p7 = por %p2973_p4, %p2972_p0 }
 0x177   : > { %p2975_p6 = pnand %p2974_p7, %p2968_p11 }
 0x179   : > { %2978 = shalt.err (!%p2975_p6)
}
 0x17a   : > { %s2979_s25 = scalar_lea.vmem %s3609_s4, 128  ;;  %s3158_s1 = smov [#allocation2]  }
 0x17b   : > { %p2980_p9 = scmp.ne.s32.totalorder %s3609_s4, %s2979_s25  ;;  %s2984_s30 = sshll.u32 %s3158_s1, 4  ;;  %s2985_s30 = int_to_ptr.vmem [resolvable:$false] %s2984_s30 }
 0x17c   : > { %s2986_s14 = scalar_lea.vmem %s2985_s30, 256  ;;  %p2987_p2 = scmp.lt.s32.totalorder %s3609_s4, %s2985_s30 }
 0x17d   : > { %p2982_p3 = pnand %p2980_p9, %p2966_p1  ;;  %p2988_p12 = scmp.lt.s32.totalorder %s2986_s14, %s2979_s25 }
 0x17f   : > { %p2983_p8 = pneg %p2982_p3  ;;  %p2989_p13 = por %p2988_p12, %p2987_p2 }
 0x181   : > { %p2990_p0 = pnand %p2989_p13, %p2983_p8 }
 0x183   : > { %2993 = shalt.err (!%p2990_p0)
}
 0x184   : > { %s4055_s20 = smov 4   ;;  %s4056_s13 = smov 64  }
 0x185   : > { %2470 = dma.hbm_to_vmem [thread:$0]  (!%p3605_p5), %s3614_s29, 128, %s3609_s4, %s3616_s26, %s4056_s13, %s4056_s13, %s4055_s20  }
 0x186   : > { %s4057_s0 = sld [smem:[#allocation41_spill]] }
 0x18c   : > { %p4058_p1 = scmp.ne.s32.totalorder %s4057_s0, 0 }
 0x18d   : > { %s4059_s21 = sld [smem:[#allocation36_spill]] (!%p4058_p1) }
 0x18e   : > { %532 = sbr.rel (%p4058_p1) target bundleno = 1730 (0x6c2), region = 72 }
 0x193   : > { %s534_s3 = sand.u32 (!%p4058_p1), 1, %s4059_s21  }
 0x194   : > { %s2253_s27 = sshll.u32 (!%p4058_p1), %s534_s3, 3  ;;  %s535_s25 = scalar_lea.sflag (!%p4058_p1), [#allocation3], %s534_s3 }
 0x195   : > { %s538_s1 = scalar_lea.vmem [#allocation2], %s2253_s27 }
 0x196   : > { %3067 = dma.done.wait (%p3573_p10), %s535_s25, 128  }
 0x197   : > { %3069 = vsyncadd (%p3573_p10), %s535_s25, 4294967168  ;;  %s4060_s5 = sld [smem:[#allocation40_spill]] }
 0x19d   : > { %p4061_p2 = scmp.ne.s32.totalorder %s4060_s5, 0 }
 0x19f   : > { %3071 = dma.done.wait (%p4061_p2), [#allocation6], 48  }
 0x1a0   : > { %3073 = vsyncadd (%p4061_p2), [#allocation6], 4294967248 }
 0x1a1   : > { %3075 = dma.done.wait (%p4061_p2), [#allocation9], 32  }
 0x1a2   : > { %3077 = vsyncadd (%p4061_p2), [#allocation9], 4294967264 }
 0x1a3   : > { %3079 = dma.done.wait (%p4061_p2), [#allocation12], 528  }
 0x1a4   : > { %3081 = vsyncadd (%p4061_p2), [#allocation12], 4294966768 }
 0x1a5   : > { %3083 = dma.done.wait (%p4061_p2), [#allocation15], 32  }
 0x1a6   : > { %3085 = vsyncadd (%p4061_p2), [#allocation15], 4294967264 }
 0x1a7   : > { %3087 = dma.done.wait (%p4061_p2), [#allocation18], 8320  }
 0x1a8   : > { %3089 = vsyncadd (%p4061_p2), [#allocation18], 4294958976 }
 0x1a9   : > { %3091 = dma.done.wait (%p4061_p2), [#allocation21], 256  }
 0x1aa   : > { %3093 = vsyncadd (%p4061_p2), [#allocation21], 4294967040  ;;  %s4062_s4 = sld [smem:[#allocation33_spill]]  ;;  %v3159_v0 = vmov 0.0   ;;  %vm3160_vm0 = vmmov 0   ;;  %vm650_vm1 = vcmask 1041408  }
 0x1ab   : > { %2359 = vmatprep.subr.bf16.mxu0 %v3159_v0  ;;  %2361 = vmatprep.mubr.msk.bf16.mxu0 %vm3160_vm0, %v3159_v0  ;;  %v633_v1 = vld [vmem:[#allocation5] sm:$0x3]  ;;  %v2609_v3 = vld [vmem:[%s538_s1] sm:$0xff]   ;;  %vm646_vm2 = vcmask 31744   ;;  %v2267_v4 = vld [vmem:[#allocation7] ss:$0 sm:$0xff] }
 0x1ac   : > { %2365 = vmatprep.subr.bf16.mxu1 %v3159_v0  ;;  %2373 = vmatprep.mubr.msk.bf16.mxu1 %vm3160_vm0, %v3159_v0  ;;  %v652_v2 = vsel %vm650_vm1, %v633_v1, 0  ;;  %vm695_vm3 = vcmask 523264   ;;  %v2610_v17 = vld [vmem:[#allocation11] sm:$0xff]   ;;  %v2611_v18 = vld [vmem:[#allocation11 + $0x8] sm:$0xff]   ;;  %v2612_v19 = vld [vmem:[#allocation11 + $0x10] sm:$0xff]   ;;  %s4063_s30 = sld [smem:[#allocation38_spill]] }
 0x1ad   : > { %2360 = vmatpush3.bf16.msra.mxu0 %v652_v2  ;;  %2366 = vmatpush3.bf16.msra.mxu1 %v2610_v17  ;;  %v2613_v20 = vld [vmem:[#allocation11 + $0x18] sm:$0xff]   ;;  %v2272_v52 = vld [vmem:[#allocation13] ss:$0 sm:$0xff]  ;;  %v883_v61 = vld [vmem:[#allocation17] sm:$0xff] }
 0x1ae   : > { %2367 = vmatprep.subr.bf16.mxu1 %v3159_v0  ;;  %v2270_v39 = vld [vmem:[#allocation8] ss:$0 sm:$0xff]  ;;  %v2271_v44 = vld [vmem:[#allocation10] ss:$0 sm:$0xff]  ;;  %v887_v62 = vld [vmem:[#allocation17 + $0x20] sm:$0xff] }
 0x1af   : > { %v884_v63 = vld [vmem:[#allocation17 + $0x8] sm:$0xff]  ;;  %v2280_v2 = vcombine.low %v883_v61, %v887_v62 }
 0x1b0   : > { %s626_s23 = sand.u32 1, %s4062_s4   ;;  %2362 = vmatmul.mubr.msk.bf16.vlgmr.msra.gmra.mrb[0].mxu0 %vm646_vm2, %v2609_v3  ;;  %v888_v1 = vld [vmem:[#allocation17 + $0x28] sm:$0xff] }
 0x1b1   : > { %s3681_s29 = sshll.u32 %s626_s23, 3  ;;  %2368 = vmatpush3.bf16.msra.mxu1 %v2611_v18  ;;  %v2282_v3 = vcombine.low %v884_v63, %v888_v1  ;;  %v904_v17 = vld [vmem:[#allocation17 + $0xa8] sm:$0xff] }
 0x1b2   : > { %2369 = vmatprep.subr.bf16.mxu1 %v3159_v0  ;;  %s3897_s26 = scalar_lea.vmem [#allocation23], %s3681_s29  ;;  %p2344_p10 = scmp.ne.s32.totalorder %s4063_s30, 0 }
 0x1b5   : > { %2370 = vmatpush3.bf16.msra.mxu1 %v2612_v19 }
 0x1b6   : > { %2371 = vmatprep.subr.bf16.mxu1 %v3159_v0  ;;  %v2281_v0 = vcombine.high %v883_v61, %v887_v62  ;;  %v940_v62 = vld [vmem:[#allocation17 + $0x1c8] sm:$0xff] }
 0x1b8   : > { %1309 = vmatprep.subr.bf16.mxu0 %v2281_v0 }
 0x1b9   : > { %2372 = vmatpush3.bf16.msra.mxu1 %v2613_v20  ;;  %1310 = vmatpush1.bf16.msra.mxu0 %v2280_v2 }
 0x283   : > { %v688_v5 = vpop.f32.mrb[0].mxu0 }
 0x284   : > { %v689_v6 = vadd.f32 %v2267_v4, %v688_v5  ;;  %v2363_v7 = vpop.f32.mrb[1].mxu0  ;;  %v891_v5 = vld [vmem:[#allocation17 + $0x40] sm:$0xff] }
 0x285   : > { %v691_v8 = vpop.f32.mrb[2].mxu0  ;;  %v892_v7 = vld [vmem:[#allocation17 + $0x48] sm:$0xff] }
 0x286   : > { %v692_v9 = vadd.f32 %v2267_v4, %v691_v8  ;;  %v2364_v10 = vpop.f32.mrb[3].mxu0  ;;  %v696_v11 = vsel %vm695_vm3, %v689_v6, 0.0  ;;  %v705_v12 = vmul.f32 %v689_v6, %v689_v6  ;;  %v2283_v4 = vcombine.high %v884_v63, %v888_v1  ;;  %v944_v63 = vld [vmem:[#allocation17 + $0x1e8] sm:$0xff] }
 0x287   : > { %697 = vadd.xlane.f32.xlu0 %v696_v11 }
 0x288   : > { %v707_v13 = vsel %vm695_vm3, %v705_v12, 0.0  ;;  %v706_v14 = vmul.f32 %v692_v9, %v692_v9  ;;  %v699_v15 = vsel %vm695_vm3, %v692_v9, 0.0  ;;  %1352 = vmatprep.subr.bf16.mxu1 %v2283_v4 }
 0x289   : > { %708 = vadd.xlane.f32.xlu1 %v707_v13  ;;  %v899_v13 = vld [vmem:[#allocation17 + $0x80] sm:$0xff] }
 0x28a   : > { %v710_v16 = vsel %vm695_vm3, %v706_v14, 0.0  ;;  %v903_v14 = vld [vmem:[#allocation17 + $0xa0] sm:$0xff] }
 0x28b   : > { %700 = vadd.xlane.f32.xlu0 %v699_v15  ;;  %v900_v15 = vld [vmem:[#allocation17 + $0x88] sm:$0xff]  ;;  %v2296_v18 = vcombine.low %v899_v13, %v903_v14 }
 0x28c   : > { %v2298_v19 = vcombine.low %v900_v15, %v904_v17  ;;  %v2299_v20 = vcombine.high %v900_v15, %v904_v17 }
 0x28d   : > { %711 = vadd.xlane.f32.xlu1 %v710_v16  ;;  %v2297_v16 = vcombine.high %v899_v13, %v903_v14 }
 0x314   : > { %v698_v21 = vpop.xlane.xlu0 %697 }
 0x315   : > { %v703_v22 = vmul.f32 0.015625, %v698_v21  ;;  %v907_v21 = vld [vmem:[#allocation17 + $0xc0] sm:$0xff] }
 0x316   : > { %v709_v23 = vpop.xlane.xlu1 %708 }
 0x317   : > { %v715_v24 = vmul.f32 %v703_v22, %v703_v22  ;;  %v713_v25 = vmul.f32 0.015625, %v709_v23  ;;  %v725_v37 = vsub.f32 %v689_v6, %v703_v22  ;;  %v895_v6 = vld [vmem:[#allocation17 + $0x60] sm:$0xff]  ;;  %v908_v23 = vld [vmem:[#allocation17 + $0xc8] sm:$0xff] }
 0x318   : > { %v701_v26 = vpop.xlane.xlu0 %700  ;;  %v2289_v8 = vcombine.high %v891_v5, %v895_v6  ;;  %v2288_v10 = vcombine.low %v891_v5, %v895_v6  ;;  %v911_v22 = vld [vmem:[#allocation17 + $0xe0] sm:$0xff]  ;;  %v2338_v5 = vcombine.low %v940_v62, %v944_v63 }
 0x319   : > { %v717_v27 = vsub.f32 %v713_v25, %v715_v24  ;;  %v704_v28 = vmul.f32 0.015625, %v701_v26  ;;  %v2305_v24 = vcombine.high %v907_v21, %v911_v22  ;;  %v912_v25 = vld [vmem:[#allocation17 + $0xe8] sm:$0xff]  ;;  %v2304_v26 = vcombine.low %v907_v21, %v911_v22 }
 0x31a   : > { %v712_v29 = vpop.xlane.xlu1 %711  ;;  %1311 = vmatprep.subr.bf16.mxu0 %v2289_v8 }
 0x31b   : > { %v719_v30 = vmax.f32 %v717_v27, 0.0  ;;  %v716_v31 = vmul.f32 %v704_v28, %v704_v28  ;;  %v714_v32 = vmul.f32 0.015625, %v712_v29  ;;  %v726_v41 = vsub.f32 %v692_v9, %v704_v28  ;;  %v896_v9 = vld [vmem:[#allocation17 + $0x68] sm:$0xff]  ;;  %1312 = vmatpush1.bf16.msra.mxu0 %v2288_v10  ;;  %v915_v29 = vld [vmem:[#allocation17 + $0x100] sm:$0xff] }
 0x31c   : > { %v2290_v11 = vcombine.low %v892_v7, %v896_v9  ;;  %v2291_v12 = vcombine.high %v892_v7, %v896_v9  ;;  %1313 = vmatprep.subr.bf16.mxu0 %v2297_v16  ;;  %v2306_v27 = vcombine.low %v908_v23, %v912_v25  ;;  %v2307_v28 = vcombine.high %v908_v23, %v912_v25 }
 0x31d   : > { %v721_v33 = vadd.f32 1e-05, %v719_v30  ;;  %v718_v34 = vsub.f32 %v714_v32, %v716_v31  ;;  %v919_v30 = vld [vmem:[#allocation17 + $0x120] sm:$0xff]  ;;  %v916_v31 = vld [vmem:[#allocation17 + $0x108] sm:$0xff] }
 0x31e   : > { %v2312_v32 = vcombine.low %v915_v29, %v919_v30 }
 0x31f   : > { %2616 = vrsqrt.f32 %v721_v33  ;;  %v720_v35 = vmax.f32 %v718_v34, 0.0  ;;  %1314 = vmatpush1.bf16.msra.mxu0 %v2296_v18  ;;  %v2313_v33 = vcombine.high %v915_v29, %v919_v30  ;;  %v920_v34 = vld [vmem:[#allocation17 + $0x128] sm:$0xff]  ;;  %v2279_v30 = vld [vmem:[#allocation16] ss:$0 sm:$0xff] }
 0x320   : > { %1315 = vmatprep.subr.bf16.mxu0 %v2305_v24 }
 0x321   : > { %v722_v36 = vadd.f32 1e-05, %v720_v35  ;;  %v923_v35 = vld [vmem:[#allocation17 + $0x140] sm:$0xff] }
 0x323   : > { %2618 = vrsqrt.f32 %v722_v36  ;;  %1316 = vmatpush1.bf16.msra.mxu0 %v2304_v26  ;;  %v927_v36 = vld [vmem:[#allocation17 + $0x160] sm:$0xff]  ;;  %v2278_v26 = vld [vmem:[#allocation14] ss:$0 sm:$0xff] }
 0x324   : > { %1317 = vmatprep.subr.bf16.mxu0 %v2313_v33 }
 0x327   : > { %1318 = vmatpush1.bf16.msra.mxu0 %v2312_v32 }
 0x329   : > { %v2617_v38 = vpop.eup %2616 }
 0x32a   : > { %v727_v40 = vmul.f32 %v2617_v38, %v725_v37  ;;  %v2314_v37 = vcombine.low %v916_v31, %v920_v34  ;;  %v2315_v38 = vcombine.high %v916_v31, %v920_v34 }
 0x32c   : > { %v736_v42 = vmul.f32 %v2270_v39, %v727_v40  ;;  %v924_v40 = vld [vmem:[#allocation17 + $0x148] sm:$0xff] }
 0x32d   : > { %v2619_v43 = vpop.eup %2618 }
 0x32e   : > { %v728_v45 = vmul.f32 %v2619_v43, %v726_v41  ;;  %v745_v47 = vadd.f32 %v2271_v44, %v736_v42  ;;  %v928_v41 = vld [vmem:[#allocation17 + $0x168] sm:$0xff]  ;;  %v931_v43 = vld [vmem:[#allocation17 + $0x180] sm:$0xff] }
 0x32f   : > { %v2323_v42 = vcombine.high %v924_v40, %v928_v41 }
 0x330   : > { %v737_v46 = vmul.f32 %v2270_v39, %v728_v45  ;;  %v747_v49 = vmax.f32 %v745_v47, 0.0  ;;  %v2321_v39 = vcombine.high %v923_v35, %v927_v36  ;;  %v3161_v45 = vmov 0   ;;  %v936_v47 = vld [vmem:[#allocation17 + $0x1a8] sm:$0xff] }
 0x331   : > { %1341 = vmatprep.mubr.bf16.mxu0 %v3161_v45 }
 0x332   : > { %v746_v48 = vadd.f32 %v2271_v44, %v737_v46  ;;  %v935_v44 = vld [vmem:[#allocation17 + $0x1a0] sm:$0xff]  ;;  %v932_v46 = vld [vmem:[#allocation17 + $0x188] sm:$0xff]  ;;  %1319 = vmatprep.subr.bf16.mxu0 %v2321_v39  ;;  %v898_v39 = vld [vmem:[#allocation17 + $0x78] sm:$0xff] }
 0x333   : > { %v2328_v0 = vcombine.low %v931_v43, %v935_v44  ;;  %v2330_v1 = vcombine.low %v932_v46, %v936_v47 }
 0x334   : > { %v748_v50 = vmax.f32 %v746_v48, 0.0  ;;  %v2320_v48 = vcombine.low %v923_v35, %v927_v36  ;;  %v893_v36 = vld [vmem:[#allocation17 + $0x50] sm:$0xff] }
 0x336   : > { %v749_v51 = vpack.c.bf16 %v748_v50, %v747_v49  ;;  %v3700_v49 = vld [vmem:[#allocation17 + $0x10] sm:$0xff]  ;;  %1320 = vmatpush1.bf16.msra.mxu0 %v2320_v48 }
 0x337   : > { %v3702_v50 = vld [vmem:[#allocation17 + $0x30] sm:$0xff] }
 0x338   : > { %2374 = vmatmul.mubr.msk.bf16.vlgmr.msra.gmra.mrb[0].mxu1 %vm695_vm3, %v749_v51  ;;  %v2322_v51 = vcombine.low %v924_v40, %v928_v41  ;;  %v2285_v6 = vcombine.high %v3700_v49, %v3702_v50 }
 0x339   : > { %1353 = vmatpush1.bf16.msra.mxu1 %v2282_v3  ;;  %1384 = vmatprep.mubr.bf16.mxu1 %v3161_v45  ;;  %v2339_v3 = vcombine.high %v940_v62, %v944_v63  ;;  %v910_v62 = vld [vmem:[#allocation17 + $0xd8] sm:$0xff] }
 0x33a   : > { %1354 = vmatprep.subr.bf16.mxu1 %v2291_v12  ;;  %v914_v63 = vld [vmem:[#allocation17 + $0xf8] sm:$0xff] }
 0x33d   : > { %1355 = vmatpush1.bf16.msra.mxu1 %v2290_v11 }
 0x33e   : > { %1356 = vmatprep.subr.bf16.mxu1 %v2299_v20 }
 0x341   : > { %1357 = vmatpush1.bf16.msra.mxu1 %v2298_v19 }
 0x342   : > { %1358 = vmatprep.subr.bf16.mxu1 %v2307_v28 }
 0x345   : > { %1359 = vmatpush1.bf16.msra.mxu1 %v2306_v27 }
 0x346   : > { %1360 = vmatprep.subr.bf16.mxu1 %v2315_v38  ;;  %v894_v38 = vld [vmem:[#allocation17 + $0x58] sm:$0xff] }
 0x349   : > { %1361 = vmatpush1.bf16.msra.mxu1 %v2314_v37  ;;  %v897_v37 = vld [vmem:[#allocation17 + $0x70] sm:$0xff] }
 0x34a   : > { %1362 = vmatprep.subr.bf16.mxu1 %v2323_v42  ;;  %v2292_v48 = vcombine.low %v893_v36, %v897_v37 }
 0x34d   : > { %1363 = vmatpush1.bf16.msra.mxu1 %v2322_v51  ;;  %v2294_v51 = vcombine.low %v894_v38, %v898_v39 }
 0x40b   : > { %v826_v53 = vpop.f32.mrb[0].mxu1 }
 0x40c   : > { %v3688_v54 = vadd.f32 %v2272_v52, %v826_v53  ;;  %v2375_v55 = vpop.f32.mrb[1].mxu1  ;;  %v2284_v53 = vcombine.low %v3700_v49, %v3702_v50 }
 0x40d   : > { %v829_v56 = vpop.f32.mrb[2].mxu1  ;;  %v3706_v55 = vld [vmem:[#allocation17 + $0x18] sm:$0xff] }
 0x40e   : > { %v3690_v57 = vadd.f32 %v2272_v52, %v829_v56  ;;  %833 = vadd.xlane.f32.xlu0 %v3688_v54  ;;  %v2376_v58 = vpop.f32.mrb[3].mxu1  ;;  %v840_v59 = vmul.f32 %v3688_v54, %v3688_v54  ;;  %v2329_v52 = vcombine.high %v931_v43, %v935_v44  ;;  %v3708_v56 = vld [vmem:[#allocation17 + $0x38] sm:$0xff]  ;;  %v2295_v43 = vcombine.high %v894_v38, %v898_v39  ;;  %v901_v44 = vld [vmem:[#allocation17 + $0x90] sm:$0xff] }
 0x40f   : > { %v2331_v58 = vcombine.high %v932_v46, %v936_v47  ;;  %v2286_v61 = vcombine.low %v3706_v55, %v3708_v56  ;;  %v2287_v7 = vcombine.high %v3706_v55, %v3708_v56  ;;  %v902_v46 = vld [vmem:[#allocation17 + $0x98] sm:$0xff]  ;;  %v2311_v55 = vcombine.high %v910_v62, %v914_v63  ;;  %v917_v56 = vld [vmem:[#allocation17 + $0x110] sm:$0xff] }
 0x410   : > { %835 = vadd.xlane.f32.xlu1 %v3690_v57  ;;  %v841_v60 = vmul.f32 %v3690_v57, %v3690_v57  ;;  %1321 = vmatprep.subr.bf16.mxu0 %v2329_v52  ;;  %v906_v47 = vld [vmem:[#allocation17 + $0xb8] sm:$0xff] }
 0x411   : > { %1364 = vmatprep.subr.bf16.mxu1 %v2331_v58  ;;  %1322 = vmatpush1.bf16.msra.mxu0 %v2328_v0  ;;  %v2303_v58 = vcombine.high %v902_v46, %v906_v47  ;;  %v2302_v50 = vcombine.low %v902_v46, %v906_v47  ;;  %v918_v0 = vld [vmem:[#allocation17 + $0x118] sm:$0xff] }
 0x412   : > { %842 = vadd.xlane.f32.xlu0 %v840_v59  ;;  %v939_v59 = vld [vmem:[#allocation17 + $0x1c0] sm:$0xff]  ;;  %1365 = vmatpush1.bf16.msra.mxu1 %v2330_v1  ;;  %v922_v1 = vld [vmem:[#allocation17 + $0x138] sm:$0xff] }
 0x413   : > { %1366 = vmatprep.subr.bf16.mxu1 %v2339_v3  ;;  %v2310_v3 = vcombine.low %v910_v62, %v914_v63 }
 0x414   : > { %844 = vadd.xlane.f32.xlu1 %v841_v60  ;;  %v943_v60 = vld [vmem:[#allocation17 + $0x1e0] sm:$0xff] }
 0x415   : > { %v2337_v2 = vcombine.high %v939_v59, %v943_v60  ;;  %v2336_v4 = vcombine.low %v939_v59, %v943_v60  ;;  %v909_v59 = vld [vmem:[#allocation17 + $0xd0] sm:$0xff] }
 0x416   : > { %1367 = vmatpush1.bf16.msra.mxu1 %v2338_v5  ;;  %v913_v60 = vld [vmem:[#allocation17 + $0xf0] sm:$0xff] }
 0x417   : > { %1323 = vmatprep.subr.bf16.mxu0 %v2337_v2  ;;  %1438 = vmatprep.subr.bf16.mxu1 %v2287_v7  ;;  %v2308_v2 = vcombine.low %v909_v59, %v913_v60  ;;  %v925_v5 = vld [vmem:[#allocation17 + $0x150] sm:$0xff]  ;;  %v926_v7 = vld [vmem:[#allocation17 + $0x158] sm:$0xff] }
 0x418   : > { %1324 = vmatpush1.bf16.msra.mxu0 %v2336_v4 }
 0x419   : > { %1395 = vmatprep.subr.bf16.mxu0 %v2285_v6  ;;  %v929_v6 = vld [vmem:[#allocation17 + $0x170] sm:$0xff] }
 0x49b   : > { %v834_v8 = vpop.xlane.xlu0 %833 }
 0x49c   : > { %v838_v9 = vmul.f32 0.0078125, %v834_v8  ;;  %v930_v8 = vld [vmem:[#allocation17 + $0x178] sm:$0xff] }
 0x49d   : > { %v836_v10 = vpop.xlane.xlu1 %835 }
 0x49e   : > { %v839_v11 = vmul.f32 0.0078125, %v836_v10  ;;  %v848_v13 = vmul.f32 %v838_v9, %v838_v9  ;;  %v858_v24 = vsub.f32 %v3688_v54, %v838_v9  ;;  %v2293_v54 = vcombine.high %v893_v36, %v897_v37 }
 0x49f   : > { %v843_v12 = vpop.xlane.xlu0 %842  ;;  %v2318_v10 = vcombine.low %v918_v0, %v922_v1 }
 0x4a0   : > { %v846_v14 = vmul.f32 0.0078125, %v843_v12  ;;  %v849_v16 = vmul.f32 %v839_v11, %v839_v11  ;;  %v859_v27 = vsub.f32 %v3690_v57, %v839_v11  ;;  %v905_v57 = vld [vmem:[#allocation17 + $0xb0] sm:$0xff]  ;;  %v2325_v11 = vcombine.high %v925_v5, %v929_v6 }
 0x4a1   : > { %v845_v15 = vpop.xlane.xlu1 %844  ;;  %v2301_v52 = vcombine.high %v901_v44, %v905_v57  ;;  %v2300_v49 = vcombine.low %v901_v44, %v905_v57  ;;  %v2327_v12 = vcombine.high %v926_v7, %v930_v8 }
 0x4a2   : > { %v850_v17 = vsub.f32 %v846_v14, %v848_v13  ;;  %v847_v18 = vmul.f32 0.0078125, %v845_v15  ;;  %v933_v13 = vld [vmem:[#allocation17 + $0x190] sm:$0xff]  ;;  %v934_v15 = vld [vmem:[#allocation17 + $0x198] sm:$0xff] }
 0x4a3   : > { %v937_v14 = vld [vmem:[#allocation17 + $0x1b0] sm:$0xff] }
 0x4a4   : > { %v852_v19 = vmax.f32 %v850_v17, 0.0  ;;  %v851_v20 = vsub.f32 %v847_v18, %v849_v16  ;;  %v938_v16 = vld [vmem:[#allocation17 + $0x1b8] sm:$0xff]  ;;  %v2324_v17 = vcombine.low %v925_v5, %v929_v6  ;;  %v2326_v18 = vcombine.low %v926_v7, %v930_v8 }
 0x4a6   : > { %v854_v21 = vadd.f32 1e-05, %v852_v19  ;;  %v853_v22 = vmax.f32 %v851_v20, 0.0  ;;  %v2333_v19 = vcombine.high %v933_v13, %v937_v14  ;;  %v2335_v20 = vcombine.high %v934_v15, %v938_v16 }
 0x4a8   : > { %2620 = vrsqrt.f32 %v854_v21  ;;  %v855_v23 = vadd.f32 1e-05, %v853_v22  ;;  %v941_v21 = vld [vmem:[#allocation17 + $0x1d0] sm:$0xff] }
 0x4a9   : > { %v945_v22 = vld [vmem:[#allocation17 + $0x1f0] sm:$0xff] }
 0x4aa   : > { %2622 = vrsqrt.f32 %v855_v23  ;;  %v942_v23 = vld [vmem:[#allocation17 + $0x1d8] sm:$0xff] }
 0x4b2   : > { %v2621_v25 = vpop.eup %2620 }
 0x4b3   : > { %v860_v28 = vmul.f32 %v2621_v25, %v858_v24  ;;  %v946_v24 = vld [vmem:[#allocation17 + $0x1f8] sm:$0xff]  ;;  %v2332_v25 = vcombine.low %v933_v13, %v937_v14 }
 0x4b4   : > { %v2623_v29 = vpop.eup %2622 }
 0x4b5   : > { %v861_v31 = vmul.f32 %v2623_v29, %v859_v27  ;;  %v869_v32 = vmul.f32 %v2278_v26, %v860_v28  ;;  %v2341_v27 = vcombine.high %v941_v21, %v945_v22  ;;  %v2343_v28 = vcombine.high %v942_v23, %v946_v24 }
 0x4b6   : > { %v2340_v29 = vcombine.low %v941_v21, %v945_v22 }
 0x4b7   : > { %v870_v33 = vmul.f32 %v2278_v26, %v861_v31  ;;  %v878_v34 = vadd.f32 %v2279_v30, %v869_v32  ;;  %v2334_v26 = vcombine.low %v934_v15, %v938_v16  ;;  %v949_v31 = vlaneseq }
 0x4b9   : > { %v879_v35 = vadd.f32 %v2279_v30, %v870_v33  ;;  %v880_v40 = vmax.f32 %v878_v34, 0.0  ;;  %v2342_v30 = vcombine.low %v942_v23, %v946_v24  ;;  %v3732_v32 = vshrl.u32 %v949_v31, 7 }
 0x4bb   : > { %v881_v41 = vmax.f32 %v879_v35, 0.0  ;;  %v3735_v33 = vsub.s32 0, %v3732_v32  ;;  %v959_v34 = vsub.s32 2, %v3732_v32  ;;  %v947_v35 = vld [vmem:[#allocation19] sm:$0xff]  ;;  %v955_v36 = vsub.s32 1, %v3732_v32 }
 0x4bc   : > { %v963_v37 = vsub.s32 3, %v3732_v32  ;;  %v979_v21 = vsub.s32 7, %v3732_v32 }
 0x4bd   : > { %v3718_v42 = vpack.c.bf16 %v881_v41, %v880_v40  ;;  %v952_v38 = vrot.slane %v947_v35, %v3735_v33  ;;  %v960_v39 = vrot.slane %v947_v35, %v959_v34  ;;  %v956_v40 = vrot.slane %v947_v35, %v955_v36 }
 0x4be   : > { %v964_v41 = vrot.slane %v947_v35, %v963_v37 }
 0x4bf   : > { %1342 = vmatmul.mubr.bf16.vlgmr.msra.gmra.mrb[4].mxu0 %v3718_v42  ;;  %1385 = vmatmul.mubr.bf16.vlgmr.msra.gmra.mrb[4].mxu1 %v3718_v42 }
 0x4c0   : > { %1396 = vmatpush1.bf16.msra.mxu0 %v2284_v53  ;;  %1439 = vmatpush1.bf16.msra.mxu1 %v2286_v61  ;;  %v2309_v53 = vcombine.high %v909_v59, %v913_v60  ;;  %v921_v61 = vld [vmem:[#allocation17 + $0x130] sm:$0xff] }
 0x4c1   : > { %1397 = vmatprep.subr.bf16.mxu0 %v2293_v54  ;;  %1440 = vmatprep.subr.bf16.mxu1 %v2295_v43  ;;  %v2317_v4 = vcombine.high %v917_v56, %v921_v61  ;;  %v2316_v9 = vcombine.low %v917_v56, %v921_v61 }
 0x4c2   : > { %1427 = vmatprep.mubr.bf16.mxu0 %v3161_v45  ;;  %1470 = vmatprep.mubr.bf16.mxu1 %v3161_v45  ;;  %v2319_v45 = vcombine.high %v918_v0, %v922_v1 }
 0x4c4   : > { %1398 = vmatpush1.bf16.msra.mxu0 %v2292_v48  ;;  %1441 = vmatpush1.bf16.msra.mxu1 %v2294_v51 }
 0x4c5   : > { %1399 = vmatprep.subr.bf16.mxu0 %v2301_v52  ;;  %1442 = vmatprep.subr.bf16.mxu1 %v2303_v58 }
 0x4c8   : > { %1400 = vmatpush1.bf16.msra.mxu0 %v2300_v49  ;;  %1443 = vmatpush1.bf16.msra.mxu1 %v2302_v50 }
 0x4c9   : > { %1401 = vmatprep.subr.bf16.mxu0 %v2309_v53  ;;  %1444 = vmatprep.subr.bf16.mxu1 %v2311_v55 }
 0x4cc   : > { %1402 = vmatpush1.bf16.msra.mxu0 %v2308_v2  ;;  %1445 = vmatpush1.bf16.msra.mxu1 %v2310_v3 }
 0x4cd   : > { %1403 = vmatprep.subr.bf16.mxu0 %v2317_v4  ;;  %1446 = vmatprep.subr.bf16.mxu1 %v2319_v45 }
 0x4d0   : > { %1404 = vmatpush1.bf16.msra.mxu0 %v2316_v9  ;;  %1447 = vmatpush1.bf16.msra.mxu1 %v2318_v10 }
 0x4d1   : > { %1405 = vmatprep.subr.bf16.mxu0 %v2325_v11  ;;  %1448 = vmatprep.subr.bf16.mxu1 %v2327_v12 }
 0x4d4   : > { %1406 = vmatpush1.bf16.msra.mxu0 %v2324_v17  ;;  %1449 = vmatpush1.bf16.msra.mxu1 %v2326_v18  ;;  %v967_v18 = vsub.s32 4, %v3732_v32 }
 0x4d5   : > { %1407 = vmatprep.subr.bf16.mxu0 %v2333_v19  ;;  %1450 = vmatprep.subr.bf16.mxu1 %v2335_v20  ;;  %v975_v19 = vsub.s32 6, %v3732_v32  ;;  %v971_v20 = vsub.s32 5, %v3732_v32 }
 0x4d6   : > { %v968_v22 = vrot.slane %v947_v35, %v967_v18 }
 0x4d7   : > { %v976_v23 = vrot.slane %v947_v35, %v975_v19  ;;  %v972_v24 = vrot.slane %v947_v35, %v971_v20  ;;  %v3162_v20 = vmov 1966171168  }
 0x4d8   : > { %1408 = vmatpush1.bf16.msra.mxu0 %v2332_v25  ;;  %1451 = vmatpush1.bf16.msra.mxu1 %v2334_v26  ;;  %v980_v25 = vrot.slane %v947_v35, %v979_v21  ;;  %v1578_v21 = vunpack.c.l.s4 %v3162_v20 }
 0x4d9   : > { %1409 = vmatprep.subr.bf16.mxu0 %v2341_v27  ;;  %1452 = vmatprep.subr.bf16.mxu1 %v2343_v28 }
 0x4dc   : > { %1410 = vmatpush1.bf16.msra.mxu0 %v2340_v29  ;;  %1453 = vmatpush1.bf16.msra.mxu1 %v2342_v30 }
 0x4df   : > { %1428 = vmatmul.mubr.bf16.vlgmr.msra.gmra.mrb[8].mxu0 %v3718_v42  ;;  %1471 = vmatmul.mubr.bf16.vlgmr.msra.gmra.mrb[8].mxu1 %v3718_v42 }
 0x592   : > { %v1343_v54 = vpop.f32.mrb[4].mxu0  ;;  %v1386_v42 = vpop.f32.mrb[4].mxu1 }
 0x593   : > { %v3741_v43 = vadd.f32 %v1343_v54, %v952_v38  ;;  %v3743_v44 = vadd.f32 %v1386_v42, %v960_v39  ;;  %v1345_v57 = vpop.f32.mrb[5].mxu0  ;;  %v1388_v46 = vpop.f32.mrb[5].mxu1 }
 0x594   : > { %v3745_v47 = vadd.f32 %v1345_v57, %v956_v40  ;;  %v1347_v48 = vpop.f32.mrb[6].mxu0  ;;  %v1390_v51 = vpop.f32.mrb[6].mxu1  ;;  %v3749_v58 = vadd.f32 %v1388_v46, %v964_v41 }
 0x595   : > { %v1502_v52 = vmul.f32 %v3741_v43, %v3741_v43  ;;  %v3751_v59 = vadd.f32 %v1347_v48, %v952_v38  ;;  %v3753_v60 = vadd.f32 %v1390_v51, %v960_v39  ;;  %v1349_v62 = vpop.f32.mrb[7].mxu0  ;;  %v1392_v63 = vpop.f32.mrb[7].mxu1  ;;  %v1504_v55 = vmul.f32 %v3743_v44, %v3743_v44 }
 0x596   : > { %v1481_v49 = vadd.f32 %v3745_v47, %v3741_v43  ;;  %v1503_v50 = vmul.f32 %v3745_v47, %v3745_v47  ;;  %v3759_v53 = vadd.f32 %v1349_v62, %v956_v40  ;;  %v1505_v45 = vmul.f32 %v3749_v58, %v3749_v58 }
 0x597   : > { %v1510_v56 = vmul.f32 %v3751_v59, %v3751_v59  ;;  %v1548_v61 = vpack.c.bf16 %v3751_v59, %v3741_v43  ;;  %v1550_v0 = vpack.c.bf16 %v3753_v60, %v3743_v44  ;;  %v1512_v5 = vmul.f32 %v3753_v60, %v3753_v60 }
 0x598   : > { %v1518_v1 = vadd.f32 %v1503_v50, %v1502_v52  ;;  %v1482_v2 = vadd.f32 %v1481_v49, %v3743_v44  ;;  %v1490_v3 = vadd.f32 %v3759_v53, %v3751_v59  ;;  %v1511_v4 = vmul.f32 %v3759_v53, %v3759_v53 }
 0x599   : > { %v1549_v6 = vpack.c.bf16 %v3759_v53, %v3745_v47  ;;  %v3780_v7 = vadd.f32 %v1392_v63, %v964_v41 }
 0x59a   : > { %v1483_v8 = vadd.f32 %v1482_v2, %v3749_v58  ;;  %v1519_v9 = vadd.f32 %v1518_v1, %v1504_v55  ;;  %v1527_v10 = vadd.f32 %v1511_v4, %v1510_v56  ;;  %v1491_v11 = vadd.f32 %v1490_v3, %v3753_v60 }
 0x59b   : > { %v1551_v12 = vpack.c.bf16 %v3780_v7, %v3749_v58  ;;  %v1513_v15 = vmul.f32 %v3780_v7, %v3780_v7 }
 0x59c   : > { %v1520_v13 = vadd.f32 %v1519_v9, %v1505_v45  ;;  %v1492_v14 = vadd.f32 %v1491_v11, %v3780_v7  ;;  %v1528_v16 = vadd.f32 %v1527_v10, %v1512_v5 }
 0x59e   : > { %v1529_v17 = vadd.f32 %v1528_v16, %v1513_v15 }
 0x5b2   : > { %v1429_v26 = vpop.f32.mrb[8].mxu0  ;;  %v1472_v27 = vpop.f32.mrb[8].mxu1 }
 0x5b3   : > { %v3793_v28 = vadd.f32 %v1429_v26, %v968_v22  ;;  %v1431_v29 = vpop.f32.mrb[9].mxu0  ;;  %v1474_v30 = vpop.f32.mrb[9].mxu1  ;;  %v3795_v31 = vadd.f32 %v1472_v27, %v976_v23 }
 0x5b4   : > { %v3797_v34 = vadd.f32 %v1431_v29, %v972_v24  ;;  %v1433_v36 = vpop.f32.mrb[10].mxu0  ;;  %v1476_v37 = vpop.f32.mrb[10].mxu1  ;;  %v3802_v40 = vadd.f32 %v1474_v30, %v980_v25 }
 0x5b5   : > { %v1484_v38 = vadd.f32 %v1483_v8, %v3793_v28  ;;  %v1506_v39 = vmul.f32 %v3793_v28, %v3793_v28  ;;  %v3804_v35 = vadd.f32 %v1433_v36, %v968_v22  ;;  %v1435_v41 = vpop.f32.mrb[11].mxu0  ;;  %v1478_v54 = vpop.f32.mrb[11].mxu1  ;;  %v3808_v57 = vadd.f32 %v1476_v37, %v976_v23  ;;  %v1574_v23 = vld [vmem:[#allocation20] sm:$0xff] }
 0x5b6   : > { %v1507_v42 = vmul.f32 %v3797_v34, %v3797_v34  ;;  %v3810_v46 = vadd.f32 %v1435_v41, %v972_v24  ;;  %v3812_v48 = vadd.f32 %v1478_v54, %v980_v25  ;;  %v1508_v4 = vmul.f32 %v3795_v31, %v3795_v31  ;;  %v1689_v25 = vld [vmem:[#allocation22] sm:$0xff] }
 0x5b7   : > { %v1521_v51 = vadd.f32 %v1520_v13, %v1506_v39  ;;  %v1485_v52 = vadd.f32 %v1484_v38, %v3797_v34  ;;  %v1493_v62 = vadd.f32 %v1492_v14, %v3804_v35  ;;  %v1514_v63 = vmul.f32 %v3804_v35, %v3804_v35 }
 0x5b8   : > { %v1552_v49 = vpack.c.bf16 %v3804_v35, %v3793_v28  ;;  %v1554_v50 = vpack.c.bf16 %v3808_v57, %v3795_v31  ;;  %v1515_v55 = vmul.f32 %v3810_v46, %v3810_v46  ;;  %v1553_v2 = vpack.c.bf16 %v3810_v46, %v3797_v34 }
 0x5b9   : > { %v1530_v56 = vadd.f32 %v1529_v17, %v1514_v63  ;;  %v1494_v1 = vadd.f32 %v1493_v62, %v3810_v46  ;;  %v1555_v3 = vpack.c.bf16 %v3812_v48, %v3802_v40  ;;  %v1486_v45 = vadd.f32 %v1485_v52, %v3795_v31 }
 0x5ba   : > { %v1522_v5 = vadd.f32 %v1521_v51, %v1507_v42  ;;  %v1516_v8 = vmul.f32 %v3808_v57, %v3808_v57  ;;  %v1509_v13 = vmul.f32 %v3802_v40, %v3802_v40  ;;  %v1517_v16 = vmul.f32 %v3812_v48, %v3812_v48 }
 0x5bb   : > { %v1495_v9 = vadd.f32 %v1494_v1, %v3808_v57  ;;  %v1531_v10 = vadd.f32 %v1530_v56, %v1515_v55  ;;  %v1487_v11 = vadd.f32 %v1486_v45, %v3802_v40  ;;  %v1579_v22 = vunpack.c.0.s8 %v1578_v21 }
 0x5bc   : > { %v1523_v14 = vadd.f32 %v1522_v5, %v1508_v4  ;;  %v1576_v27 = vcombine.high %v1574_v23, %v1574_v23  ;;  %v1691_v36 = vcombine.high %v1689_v25, %v1689_v25 }
 0x5bd   : > { %v1496_v15 = vadd.f32 %v1495_v9, %v3812_v48  ;;  %v1532_v17 = vadd.f32 %v1531_v10, %v1516_v8  ;;  %1488 = vadd.xlane.f32.xlu0 %v1487_v11  ;;  %v3842_v24 = vsub.s32 %v1579_v22, %v3732_v32 }
 0x5be   : > { %v1524_v18 = vadd.f32 %v1523_v14, %v1509_v13 }
 0x5bf   : > { %1497 = vadd.xlane.f32.xlu1 %v1496_v15  ;;  %v1533_v19 = vadd.f32 %v1532_v17, %v1517_v16  ;;  %v1583_v37 = vrot.slane %v1574_v23, %v3842_v24  ;;  %v1590_v41 = vrot.slane %v1576_v27, %v3842_v24  ;;  %v1698_v42 = vrot.slane %v1689_v25, %v3842_v24 }
 0x5c0   : > { %v1705_v32 = vrot.slane %v1691_v36, %v3842_v24 }
 0x5c1   : > { %1525 = vadd.xlane.f32.xlu0 %v1524_v18  ;;  %v1591_v62 = vcombine.high %v1583_v37, %v1583_v37  ;;  %v1592_v56 = vcombine.high %v1590_v41, %v1590_v41  ;;  %v1706_v4 = vcombine.high %v1698_v42, %v1698_v42  ;;  %v1599_v9 = vrot.slane %v1583_v37, %v3842_v24 }
 0x5c2   : > { %v1707_v5 = vcombine.high %v1705_v32, %v1705_v32  ;;  %v1606_v10 = vrot.slane %v1590_v41, %v3842_v24  ;;  %v1714_v16 = vrot.slane %v1698_v42, %v3842_v24  ;;  %v1721_v18 = vrot.slane %v1705_v32, %v3842_v24 }
 0x5c3   : > { %1534 = vadd.xlane.f32.xlu1 %v1533_v19  ;;  %v1613_v13 = vrot.slane %v1591_v62, %v3842_v24  ;;  %v1620_v14 = vrot.slane %v1592_v56, %v3842_v24  ;;  %v1728_v17 = vrot.slane %v1706_v4, %v3842_v24  ;;  %v1621_v21 = vcombine.high %v1599_v9, %v1599_v9 }
 0x5c4   : > { %v1735_v19 = vrot.slane %v1707_v5, %v3842_v24  ;;  %v1626_v22 = vpack.i.b16 %v1599_v9, %v1599_v9  ;;  %v1622_v23 = vcombine.high %v1606_v10, %v1606_v10  ;;  %v1736_v27 = vcombine.high %v1714_v16, %v1714_v16 }
 0x5c5   : > { %v1623_v25 = vcombine.high %v1613_v13, %v1613_v13  ;;  %v1654_v36 = vpack.i.b16 %v1606_v10, %v1606_v10  ;;  %v1737_v37 = vcombine.high %v1721_v18, %v1721_v18  ;;  %v1640_v42 = vpack.i.b16 %v1621_v21, %v1621_v21 }
 0x5c6   : > { %v1631_v41 = vrot.slane %v1626_v22, %v3735_v33  ;;  %v1668_v32 = vpack.i.b16 %v1622_v23, %v1622_v23  ;;  %v1755_v56 = vpack.i.b16 %v1736_v27, %v1736_v27  ;;  %v1769_v4 = vpack.i.b16 %v1721_v18, %v1721_v18 }
 0x5c7   : > { %v1776_v5 = vpack.i.b16 %v1735_v19, %v1735_v19 }
 0x5c8   : > { %v1774_v21 = vrot.slane %v1769_v4, %v3735_v33 }
 0x64a   : > { %v1489_v26 = vpop.xlane.xlu0 %1488 }
 0x64b   : > { %v1500_v30 = vmul.f32 0.0009765625, %v1489_v26  ;;  %v1624_v26 = vcombine.high %v1620_v14, %v1620_v14 }
 0x64c   : > { %v1498_v29 = vpop.xlane.xlu1 %1497 }
 0x64d   : > { %v1501_v38 = vmul.f32 0.0009765625, %v1498_v29  ;;  %v1538_v52 = vmul.f32 %v1500_v30, %v1500_v30  ;;  %v1738_v29 = vcombine.high %v1728_v17, %v1728_v17  ;;  %v1675_v62 = vpack.i.b16 %v1624_v26, %v1624_v26 }
 0x64e   : > { %v1526_v39 = vpop.xlane.xlu0 %1525 }
 0x64f   : > { %v1536_v54 = vmul.f32 0.0009765625, %v1526_v39  ;;  %v1539_v63 = vmul.f32 %v1501_v38, %v1501_v38  ;;  %v1739_v39 = vcombine.high %v1735_v19, %v1735_v19  ;;  %v1760_v19 = vrot.slane %v1755_v56, %v3735_v33 }
 0x650   : > { %v1535_v51 = vpop.xlane.xlu1 %1534 }
 0x651   : > { %v1540_v55 = vsub.f32 %v1536_v54, %v1538_v52  ;;  %v1537_v1 = vmul.f32 0.0009765625, %v1535_v51  ;;  %v1633_v54 = vpack.i.b16 %v1613_v13, %v1613_v13  ;;  %v1661_v51 = vpack.i.b16 %v1620_v14, %v1620_v14 }
 0x652   : > { %v1647_v52 = vpack.i.b16 %v1623_v25, %v1623_v25  ;;  %v1790_v9 = vpack.i.b16 %v1739_v39, %v1739_v39  ;;  %v1659_v13 = vrot.slane %v1654_v36, %v3735_v33  ;;  %v1781_v25 = vrot.slane %v1776_v5, %v3735_v33 }
 0x653   : > { %v1542_v45 = vmax.f32 %v1540_v55, 0.0  ;;  %v1541_v8 = vsub.f32 %v1537_v1, %v1539_v63  ;;  %v1741_v63 = vpack.i.b16 %v1714_v16, %v1714_v16  ;;  %v1748_v55 = vpack.i.b16 %v1728_v17, %v1728_v17 }
 0x654   : > { %v1762_v1 = vpack.i.b16 %v1738_v29, %v1738_v29  ;;  %v1638_v10 = vrot.slane %v1633_v54, %v3735_v33  ;;  %v1666_v14 = vrot.slane %v1661_v51, %v3735_v33  ;;  %v1673_v16 = vrot.slane %v1668_v32, %v3735_v33 }
 0x655   : > { %v1544_v11 = vadd.f32 1e-05, %v1542_v45  ;;  %v1543_v15 = vmax.f32 %v1541_v8, 0.0  ;;  %v1556_v45 = vpack.c.bf16 %v1501_v38, %v1500_v30  ;;  %v1783_v8 = vpack.i.b16 %v1737_v37, %v1737_v37 }
 0x656   : > { %v1680_v17 = vrot.slane %v1675_v62, %v3735_v33  ;;  %v1746_v18 = vrot.slane %v1741_v63, %v3735_v33  ;;  %v1753_v38 = vrot.slane %v1748_v55, %v3735_v33  ;;  %v1795_v27 = vrot.slane %v1790_v9, %v3735_v33 }
 0x657   : > { %v1545_v20 = vadd.f32 1e-05, %v1543_v15  ;;  %2624 = vrsqrt.f32 %v1544_v11  ;;  %v1645_v11 = vrot.slane %v1640_v42, %v3735_v33  ;;  %v1652_v15 = vrot.slane %v1647_v52, %v3735_v33 }
 0x658   : > { %v1557_v23 = vsub.bf16 %v1548_v61, %v1556_v45  ;;  %v1788_v26 = vrot.slane %v1783_v8, %v3735_v33  ;;  %v1558_v29 = vsub.bf16 %v1549_v6, %v1556_v45  ;;  %v1559_v36 = vsub.bf16 %v1550_v0, %v1556_v45 }
 0x659   : > { %2626 = vrsqrt.f32 %v1545_v20  ;;  %v1767_v20 = vrot.slane %v1762_v1, %v3735_v33  ;;  %v1560_v37 = vsub.bf16 %v1551_v12, %v1556_v45  ;;  %v1561_v59 = vsub.bf16 %v1552_v49, %v1556_v45 }
 0x65a   : > { %v1562_v33 = vsub.bf16 %v1553_v2, %v1556_v45  ;;  %v1563_v47 = vsub.bf16 %v1554_v50, %v1556_v45  ;;  %v1564_v44 = vsub.bf16 %v1555_v3, %v1556_v45 }
 0x661   : > { %v2625_v30 = vpop.eup %2624 }
 0x663   : > { %v2627_v22 = vpop.eup %2626 }
 0x664   : > { %v1565_v43 = vpack.c.bf16 %v2627_v22, %v2625_v30 }
 0x666   : > { %v1566_v60 = vmul.bf16 %v1565_v43, %v1557_v23  ;;  %v1567_v58 = vmul.bf16 %v1565_v43, %v1558_v29  ;;  %v1568_v53 = vmul.bf16 %v1565_v43, %v1559_v36  ;;  %v1569_v61 = vmul.bf16 %v1565_v43, %v1560_v37 }
 0x667   : > { %v1570_v0 = vmul.bf16 %v1565_v43, %v1561_v59  ;;  %v1571_v6 = vmul.bf16 %v1565_v43, %v1562_v33  ;;  %v1572_v7 = vmul.bf16 %v1565_v43, %v1563_v47  ;;  %v1573_v12 = vmul.bf16 %v1565_v43, %v1564_v44 }
 0x668   : > { %v1681_v28 = vmul.bf16 %v1631_v41, %v1566_v60  ;;  %v1682_v35 = vmul.bf16 %v1638_v10, %v1567_v58  ;;  %v1683_v34 = vmul.bf16 %v1645_v11, %v1568_v53  ;;  %v1684_v46 = vmul.bf16 %v1652_v15, %v1569_v61 }
 0x669   : > { %v1685_v49 = vmul.bf16 %v1659_v13, %v1570_v0  ;;  %v1686_v2 = vmul.bf16 %v1666_v14, %v1571_v6  ;;  %v1687_v31 = vmul.bf16 %v1673_v16, %v1572_v7  ;;  %v1688_v57 = vmul.bf16 %v1680_v17, %v1573_v12 }
 0x66a   : > { %v1796_v50 = vadd.bf16 %v1746_v18, %v1681_v28  ;;  %v1797_v39 = vadd.bf16 %v1753_v38, %v1682_v35  ;;  %v1798_v40 = vadd.bf16 %v1760_v19, %v1683_v34  ;;  %v1799_v48 = vadd.bf16 %v1767_v20, %v1684_v46 }
 0x66b   : > { %v1800_v3 = vadd.bf16 %v1774_v21, %v1685_v49  ;;  %v1801_v54 = vadd.bf16 %v1781_v25, %v1686_v2  ;;  %v1802_v42 = vadd.bf16 %v1788_v26, %v1687_v31  ;;  %v1803_v51 = vadd.bf16 %v1795_v27, %v1688_v57 }
 0x66c   : > { %v1804_v52 = vunpack.i.l.bf16 %v1796_v50  ;;  %v1805_v32 = vunpack.i.h.bf16 %v1796_v50  ;;  %v1814_v62 = vunpack.i.l.bf16 %v1797_v39  ;;  %v1815_v63 = vunpack.i.h.bf16 %v1797_v39 }
 0x66d   : > { %v1824_v41 = vunpack.i.l.bf16 %v1798_v40  ;;  %v1825_v55 = vunpack.i.h.bf16 %v1798_v40  ;;  %v1834_v56 = vunpack.i.l.bf16 %v1799_v48  ;;  %v1835_v1 = vunpack.i.h.bf16 %v1799_v48 }
 0x66e   : > { %v1806_v4 = vmax.f32 %v1804_v52, %v1805_v32  ;;  %v1816_v45 = vmax.f32 %v1814_v62, %v1815_v63  ;;  %v1844_v5 = vunpack.i.l.bf16 %v1800_v3  ;;  %v1845_v8 = vunpack.i.h.bf16 %v1800_v3 }
 0x66f   : > { %v1826_v9 = vmax.f32 %v1824_v41, %v1825_v55  ;;  %v1836_v10 = vmax.f32 %v1834_v56, %v1835_v1  ;;  %v1854_v11 = vunpack.i.l.bf16 %v1801_v54  ;;  %v1855_v13 = vunpack.i.h.bf16 %v1801_v54 }
 0x670   : > { %v1807_v14 = vrot.slane %v1806_v4, 4  ;;  %v1817_v15 = vrot.slane %v1816_v45, 4  ;;  %v1846_v16 = vmax.f32 %v1844_v5, %v1845_v8  ;;  %v1864_v17 = vunpack.i.l.bf16 %v1802_v42 }
 0x671   : > { %v1827_v18 = vrot.slane %v1826_v9, 4  ;;  %v1837_v30 = vrot.slane %v1836_v10, 4  ;;  %v1856_v38 = vmax.f32 %v1854_v11, %v1855_v13  ;;  %v1865_v19 = vunpack.i.h.bf16 %v1802_v42 }
 0x672   : > { %v1808_v20 = vmax.f32 %v1806_v4, %v1807_v14  ;;  %v1818_v21 = vmax.f32 %v1816_v45, %v1817_v15  ;;  %v1847_v22 = vrot.slane %v1846_v16, 4  ;;  %v1874_v23 = vunpack.i.l.bf16 %v1803_v51 }
 0x673   : > { %v1828_v25 = vmax.f32 %v1826_v9, %v1827_v18  ;;  %v1838_v26 = vmax.f32 %v1836_v10, %v1837_v30  ;;  %v1857_v27 = vrot.slane %v1856_v38, 4  ;;  %v1866_v29 = vmax.f32 %v1864_v17, %v1865_v19 }
 0x674   : > { %v1809_v36 = vrot.slane %v1808_v20, 2  ;;  %v1819_v37 = vrot.slane %v1818_v21, 2  ;;  %v1848_v43 = vmax.f32 %v1846_v16, %v1847_v22  ;;  %v1875_v59 = vunpack.i.h.bf16 %v1803_v51 }
 0x675   : > { %v1829_v33 = vrot.slane %v1828_v25, 2  ;;  %v1839_v47 = vrot.slane %v1838_v26, 2  ;;  %v1858_v44 = vmax.f32 %v1856_v38, %v1857_v27  ;;  %v1867_v60 = vrot.slane %v1866_v29, 4 }
 0x676   : > { %v1810_v58 = vmax.f32 %v1808_v20, %v1809_v36  ;;  %v1820_v53 = vmax.f32 %v1818_v21, %v1819_v37  ;;  %v1849_v61 = vrot.slane %v1848_v43, 2  ;;  %v1876_v0 = vmax.f32 %v1874_v23, %v1875_v59 }
 0x677   : > { %v1830_v6 = vmax.f32 %v1828_v25, %v1829_v33  ;;  %v1840_v7 = vmax.f32 %v1838_v26, %v1839_v47  ;;  %v1859_v12 = vrot.slane %v1858_v44, 2  ;;  %v1868_v28 = vmax.f32 %v1866_v29, %v1867_v60 }
 0x678   : > { %v1811_v35 = vrot.slane %v1810_v58, 1  ;;  %v1821_v34 = vrot.slane %v1820_v53, 1  ;;  %v1850_v46 = vmax.f32 %v1848_v43, %v1849_v61  ;;  %v1877_v49 = vrot.slane %v1876_v0, 4 }
 0x679   : > { %v1831_v2 = vrot.slane %v1830_v6, 1  ;;  %v1841_v31 = vrot.slane %v1840_v7, 1  ;;  %v1860_v57 = vmax.f32 %v1858_v44, %v1859_v12  ;;  %v1869_v50 = vrot.slane %v1868_v28, 2 }
 0x67a   : > { %v1812_v39 = vmax.f32 %v1810_v58, %v1811_v35  ;;  %v1822_v40 = vmax.f32 %v1820_v53, %v1821_v34  ;;  %v1851_v48 = vrot.slane %v1850_v46, 1  ;;  %v1878_v3 = vmax.f32 %v1876_v0, %v1877_v49 }
 0x67b   : > { %v1832_v54 = vmax.f32 %v1830_v6, %v1831_v2  ;;  %v1842_v42 = vmax.f32 %v1840_v7, %v1841_v31  ;;  %v1861_v51 = vrot.slane %v1860_v57, 1  ;;  %v1870_v52 = vmax.f32 %v1868_v28, %v1869_v50 }
 0x67c   : > { %v1813_v32 = vpack.i.bf16 %v1812_v39, %v1812_v39  ;;  %v1823_v62 = vpack.i.bf16 %v1822_v40, %v1822_v40  ;;  %v1852_v63 = vmax.f32 %v1850_v46, %v1851_v48  ;;  %v1879_v41 = vrot.slane %v1878_v3, 2 }
 0x67d   : > { %v1833_v55 = vpack.i.bf16 %v1832_v54, %v1832_v54  ;;  %v1843_v56 = vpack.i.bf16 %v1842_v42, %v1842_v42  ;;  %v1862_v1 = vmax.f32 %v1860_v57, %v1861_v51  ;;  %v1871_v4 = vrot.slane %v1870_v52, 1 }
 0x67e   : > { %v1853_v45 = vpack.i.bf16 %v1852_v63, %v1852_v63  ;;  %v1880_v5 = vmax.f32 %v1878_v3, %v1879_v41  ;;  %v1884_v8 = vunpack.c.l.bf16 %v1813_v32  ;;  %v1885_v9 = vunpack.c.l.bf16 %v1823_v62 }
 0x67f   : > { %v1863_v10 = vpack.i.bf16 %v1862_v1, %v1862_v1  ;;  %v1872_v11 = vmax.f32 %v1870_v52, %v1871_v4  ;;  %v1886_v13 = vunpack.c.l.bf16 %v1833_v55  ;;  %v1887_v14 = vunpack.c.l.bf16 %v1843_v56 }
 0x680   : > { %v1881_v15 = vrot.slane %v1880_v5, 1  ;;  %v1888_v16 = vunpack.c.l.bf16 %v1853_v45  ;;  %1895 = sbr.rel (%p2344_p10) target bundleno = 1683 (0x693), region = 128  ;;  %v1904_v21 = vcombine.low (!%p2344_p10), %v1884_v8, %v1885_v9 }
 0x681   : > { %v1873_v17 = vpack.i.bf16 %v1872_v11, %v1872_v11  ;;  %v1889_v18 = vunpack.c.l.bf16 %v1863_v10  ;;  %v1905_v22 = vcombine.low (!%p2344_p10), %v1886_v13, %v1887_v14 }
 0x682   : > { %v1882_v30 = vmax.f32 %v1880_v5, %v1881_v15  ;;  %v1914_v26 = vrot.slane (!%p2344_p10), %v1904_v21, %v3842_v24 }
 0x683   : > { %v1890_v38 = vunpack.c.l.bf16 %v1873_v17  ;;  %v1906_v23 = vcombine.low (!%p2344_p10), %v1888_v16, %v1889_v18  ;;  %v1921_v27 = vrot.slane (!%p2344_p10), %v1905_v22, %v3842_v24 }
 0x684   : > { %v1883_v19 = vpack.i.bf16 %v1882_v30, %v1882_v30 }
 0x685   : > { %v1928_v29 = vrot.slane (!%p2344_p10), %v1906_v23, %v3842_v24  ;;  %v1936_v37 = vcombine.low (!%p2344_p10), %v1914_v26, %v1921_v27 }
 0x686   : > { %v1891_v20 = vunpack.c.l.bf16 %v1883_v19 }
 0x687   : > { %v1944_v59 = vrot.slane %v1936_v37, %v3842_v24 }
 0x688   : > { %v1907_v25 = vcombine.low %v1890_v38, %v1891_v20 }
 0x68a   : > { %v1935_v36 = vrot.slane %v1907_v25, %v3842_v24 }
 0x68c   : > { %v1937_v43 = vcombine.low %v1928_v29, %v1935_v36 }
 0x68e   : > { %v1951_v33 = vrot.slane %v1937_v43, %v3842_v24 }
 0x690   : > { %v1952_v47 = vcombine.low %v1944_v59, %v1951_v33 }
 0x692   : > { %1954 = vst [vmem:[%s3897_s26] sm:$0xff] %v1952_v47 }
 0x693 PF: > { %s4064_s14 = sld [smem:[#allocation38_spill]] }
 0x699   : > { %p2345_p8 = scmp.le.s32.totalorder %s4064_s14, 0 }
 0x69a   : > { %v1968_v44 = vcombine.low (!%p2345_p8), %v1884_v8, %v1885_v9  ;;  %v1969_v60 = vcombine.low (!%p2345_p8), %v1886_v13, %v1887_v14  ;;  %v1970_v58 = vcombine.low (!%p2345_p8), %v1888_v16, %v1889_v18  ;;  %v1971_v53 = vcombine.low (!%p2345_p8), %v1890_v38, %v1891_v20  ;;  %v1959_v46 = vld [vmem:[%s3897_s26] sm:$0xff] (!%p2345_p8) }
 0x69b   : > { %1958 = sbr.rel (%p2345_p8) target bundleno = 1703 (0x6a7), region = 132 }
 0x69c   : > { %v1978_v61 = vrot.slane (!%p2345_p8), %v1968_v44, %v3842_v24  ;;  %v1985_v0 = vrot.slane (!%p2345_p8), %v1969_v60, %v3842_v24  ;;  %v1992_v6 = vrot.slane (!%p2345_p8), %v1970_v58, %v3842_v24  ;;  %v1999_v7 = vrot.slane (!%p2345_p8), %v1971_v53, %v3842_v24 }
 0x69e   : > { %v2000_v12 = vcombine.low (!%p2345_p8), %v1978_v61, %v1985_v0  ;;  %v2001_v28 = vcombine.low (!%p2345_p8), %v1992_v6, %v1999_v7 }
 0x6a0   : > { %v2008_v35 = vrot.slane (!%p2345_p8), %v2000_v12, %v3842_v24  ;;  %v2015_v34 = vrot.slane (!%p2345_p8), %v2001_v28, %v3842_v24 }
 0x6a2   : > { %v2016_v49 = vcombine.low %v2008_v35, %v2015_v34 }
 0x6a4   : > { %v2018_v2 = vmax.f32 %v1959_v46, %v2016_v49 }
 0x6a6   : > { %2019 = vst [vmem:[%s3897_s26] sm:$0xff] %v2018_v2 }
 0x6a7 PF: > { %s4065_s20 = sld [smem:[#allocation39_spill]]  ;;  %s2035_s5 = sshll.u32 %s3897_s26, 4  ;;  %s2036_s5 = int_to_ptr.vmem [resolvable:$true] %s2035_s5 }
 0x6a8   : > { %s4067_s27 = sld [smem:[#allocation49_spill]]  ;;  %s2021_s4 = scalar_lea.sflag [#allocation4], %s626_s23 }
 0x6a9   : > { %s2994_s29 = scalar_lea.vmem %s2036_s5, 128  ;;  %p4069_p11 = scmp.ne.s32.totalorder %s4050_s28, 0 }
 0x6aa   : > { %p2995_p5 = scmp.ne.s32.totalorder %s2036_s5, %s2994_s29  ;;  %s3163_s30 = smov [#allocation23]  }
 0x6ab   : > { %s2998_s14 = sshll.u32 %s3163_s30, 4  ;;  %s2999_s14 = int_to_ptr.vmem [resolvable:$false] %s2998_s14 }
 0x6ac   : > { %p2996_p4 = pnand %p2995_p5, %p4069_p11  ;;  %s3000_s6 = scalar_lea.vmem %s2999_s14, 256 }
 0x6ad   : > { %s2351_s0 = sshll.u32 %s4065_s20, 7  ;;  %p3001_p6 = scmp.lt.s32.totalorder %s2036_s5, %s2999_s14 }
 0x6ae   : > { %s4068_s1 = smov %s4067_s27  ;;  %s3920_s25 = scalar_lea.hbm %s4067_s27, %s2351_s0 }
 0x6af   : > { %p2997_p7 = pneg %p2996_p4  ;;  %p3002_p9 = scmp.lt.s32.totalorder %s3000_s6, %s2994_s29 }
 0x6b1   : > { %p3003_p3 = por %p3002_p9, %p3001_p6 }
 0x6b3   : > { %p3004_p12 = pnand %p3003_p3, %p2997_p7 }
 0x6b5   : > { %3007 = shalt.err (!%p3004_p12)
}
 0x6b6   : > { %s3008_s23 = scalar_lea.hbm %s3920_s25, 128  ;;  %s3012_s13 = scalar_lea.hbm %s4068_s1, 256 }
 0x6b7   : > { %p3009_p13 = scmp.ne.s32.totalorder %s3920_s25, %s3008_s23  ;;  %p3013_p2 = scmp.lt.u32.totalorder %s3920_s25, %s4068_s1 }
 0x6b8   : > { %p3014_p10 = scmp.lt.u32.totalorder %s3012_s13, %s3008_s23  ;;  %p3016_p5 = scmp.lt.u32.totalorder %s3008_s23, %s3920_s25 }
 0x6b9   : > { %p3010_p0 = pnand %p3009_p13, %p4069_p11 }
 0x6ba   : > { %p3015_p8 = por %p3014_p10, %p3013_p2 }
 0x6bb   : > { %p3011_p1 = pneg %p3010_p0 }
 0x6bc   : > { %p3017_p4 = por %p3016_p5, %p3015_p8 }
 0x6be   : > { %p3018_p7 = pnand %p3017_p4, %p3011_p1 }
 0x6c0   : > { %3021 = shalt.err (!%p3018_p7)
}
 0x6c1   : > { %2428 = dma.vmem_to_hbm [thread:$0]  (%p4069_p11), %s2036_s5, 128, %s3920_s25, %s2021_s4  }
 0x6c2 PF: > { %s4070_s6 = sld [smem:[#allocation32_spill]]  ;;  %p2500_p6 = scmp.ge.s32.totalorder %s3140_s18, 2 }
 0x6c3   : > { %p4071_p9 = scmp.ne.s32.totalorder %s4051_s2, 0 }
 0x6c5   : > { %p2472_p3 = pnand %p2500_p6, %p4071_p9 }
 0x6c8   : > { %s2047_s3 = sand.u32 1, %s4070_s6  }
 0x6c9   : > { %s2048_s27 = scalar_lea.sflag [#allocation4], %s2047_s3 }
 0x6ca   : > { %3095 = dma.done.wait (!%p2472_p3), %s2048_s27, 128  }
 0x6cb   : > { %3097 = vsyncadd (!%p2472_p3), %s2048_s27, 4294967168  ;;  %s35_s18 = sadd.s32 1, %s3140_s18   ;;  %s4072_s25 = sld [smem:[#allocation33_spill]] }
 0x6cc   : > { %p32_p12 = scmp.ge.s32.totalorder %s35_s18, 8   ;;  %s4073_s26 = sld [smem:[#allocation34_spill]] }
 0x6cd   : > { %s4074_s28 = sld [smem:[#allocation36_spill]]  ;;  %s4075_s29 = sld [smem:[#allocation37_spill]] }
 0x6ce   : > { %s4076_s5 = smov %s4088_s15  ;;  %s4077_s27 = smov %s4090_s22 }
 0x6cf   : > { %s4078_s30 = smov %s3591_s24  ;;  %s4079_s14 = smov %s3132_s16 }
 0x6d0   : > { %s4080_s15 = smov %s3136_s17  ;;  %s4081_s16 = smov %s4084_s19 }
 0x6d1   : > { %s4082_s17 = smov %s4076_s5  ;;  %34 = sbr.rel (!%p32_p12) target bundleno = 24 (0x18), region = 173 }
 0x6d8   :  { %2053 = vsyncpa [#allocation3], 1 }
 0x6d9   :  { %2055 = vsyncpa [#allocation3 + $0x1], 1 }
 0x6da   :  { %2056 = vsyncpa [#allocation6], 1 }
 0x6db   :  { %2057 = vsyncpa [#allocation9], 1 }
 0x6dc   :  { %2058 = vsyncpa [#allocation12], 1 }
 0x6dd   :  { %2059 = vsyncpa [#allocation15], 1 }
 0x6de   :  { %2060 = vsyncpa [#allocation18], 1 }
 0x6df   :  { %2061 = vsyncpa [#allocation21], 1 }
 0x6e0   :  { %2062 = vsyncpa [#allocation4], 1 }
 0x6e1   :  { %2064 = vsyncpa [#allocation4 + $0x1], 1 }

</bundles_post_ra>
